<compile_context>
chip_gen: v7x
topology: tpu7x:2x2x1
jax: 0.10.0
libtpu: 0.0.40
codegen_flags: <defaults>
</compile_context>

<pallas_src>
import math

import jax
import jax.numpy as jnp
from jax.experimental import pallas as pl
from jax.experimental.pallas import tpu as pltpu


T_CHUNK = 8            # time sub-chunk for the selective scan (one sublane tile)
L_CHUNK_TARGET = 256   # sequence-chunk grid tile (re-derive smaller for v7x)
ED_TILE_TARGET = 512   # lane tile for the scan state
# Above the 16 MiB (v5e) / 32 MiB (v6e, v7x) scoped defaults, below v7x's
# 64 MiB physical VMEM.  Raise toward ~100 MiB on v5e/v6e if chunks grow.
VMEM_LIMIT_BYTES = 48 * 1024 * 1024


# ----------------------------- helpers ---------------------------------------

def _pick_tile(total, target, quantum):
    """Largest tile <= target (multiple of quantum) dividing total, else total."""
    if total <= target:
        return total
    t = (target // quantum) * quantum
    while t >= quantum:
        if total % t == 0:
            return t
        t -= quantum
    return total


def _sigmoid(x):
    return 1.0 / (1.0 + jnp.exp(-x))


def _silu(x):
    return x * _sigmoid(x)


def _softplus(x):
    # numerically stable softplus using only exp/log/abs/max
    return jnp.maximum(x, 0.0) + jnp.log(1.0 + jnp.exp(-jnp.abs(x)))


# contracting dims ((1,), (1,)) == a @ b.T without materializing a transpose
_CDIMS_T = (((1,), (1,)), ((), ()))


# ----------------------------- Pallas kernels --------------------------------

def mamba_block_kernel(x_ref, normw_ref, wix_ref, wiz_ref, convw_ref,
                       convb_ref, wxdt_ref, wxbc_ref, wdt_ref, bdt_ref,
                       alog_ref, dvec_ref, wout_ref, o_ref,
                       delta_scr, dx_scr, bc_scr, y_scr, h_scr, conv_scr):
    """Fused RMSNorm -> MambaBlock mixer -> residual, one (batch, L-chunk) tile.

    x_ref : (1, LC, D)  residual-stream input chunk
    o_ref : (1, LC, D)  mixer(norm(x)) + x
    h_scr : (N, ED)     SSM state, carried across L-chunks
    conv_scr : (K-1, ED) last conv-input rows of the previous chunk
    """
    f32 = jnp.float32
    bf16 = jnp.bfloat16
    c = pl.program_id(1)

    x = x_ref[0]                          # (LC, D) f32
    LC, D = x.shape
    ED = wix_ref.shape[0]
    N = alog_ref.shape[0]
    K = convw_ref.shape[0]
    n_sub = LC // T_CHUNK
    ed_t = _pick_tile(ED, ED_TILE_TARGET, 128)
    n_ed = ED // ed_t

    # ---- reset chunk-carried state at the start of each sequence ----
    @pl.when(c == 0)
    def _():
        h_scr[...] = jnp.zeros(h_scr.shape, h_scr.dtype)
        conv_scr[...] = jnp.zeros(conv_scr.shape, conv_scr.dtype)

    # ---- fused RMSNorm ----
    ms = jnp.mean(x * x, axis=-1, keepdims=True)
    xn_b = (x * jax.lax.rsqrt(ms + 1e-5) * normw_ref[...]).astype(bf16)

    # ---- in_proj (x half) : MXU bf16 ----
    xb = jax.lax.dot_general(xn_b, wix_ref[...], _CDIMS_T,
                             preferred_element_type=f32)      # (LC, ED)

    # ---- causal depthwise conv1d, chunk-carried, no padded-scratch trip ----
    prev = conv_scr[...]                                      # (K-1, ED)
    conv_scr[...] = xb[LC - (K - 1):, :]                      # carry for next chunk
    xb_ext = jnp.concatenate([prev, xb], axis=0)              # (LC+K-1, ED)
    convw = convw_ref[...]                                    # (K, ED) f32
    acc = jnp.broadcast_to(convb_ref[...], (LC, ED))
    for k in range(K):                                        # K small & static
        acc = acc + xb_ext[k:k + LC, :] * convw[k:k + 1, :]
    xc = _silu(acc)                                           # (LC, ED) f32
    xc_b = xc.astype(bf16)

    # ---- data-dependent SSM parameters (B|C merged into one matmul) ----
    delta_r = jax.lax.dot_general(xc_b, wxdt_ref[...], _CDIMS_T,
                                  preferred_element_type=f32)  # (LC, dt_rank)
    bc = jax.lax.dot_general(xc_b, wxbc_ref[...], _CDIMS_T,
                             preferred_element_type=f32)       # (LC, 2N)
    delta = _softplus(
        jax.lax.dot_general(delta_r, wdt_ref[...], _CDIMS_T,
                            preferred_element_type=f32) + bdt_ref[...])  # (LC, ED)

    delta_scr[...] = delta
    dx_scr[...] = delta * xc
    bc_scr[...] = bc
    y_scr[...] = dvec_ref[...] * xc        # skip term D*x pre-accumulated into y

    a_neg = -jnp.exp(alog_ref[...])        # (N, ED)

    # ---- selective scan: 8-row time sub-chunks x ED lane tiles ----
    @pl.loop(0, n_sub)
    def _scan(s):
        t0 = pl.multiple_of(s * T_CHUNK, T_CHUNK)
        bcv = bc_scr[pl.ds(t0, T_CHUNK), :]                    # (T, 2N)
        b_c = bcv[:, 0:N]                                      # (T, N)
        c_c = bcv[:, N:2 * N]                                  # (T, N)
        for e in range(n_ed):                                  # static ED tiling
            e0 = e * ed_t
            d_c = delta_scr[pl.ds(t0, T_CHUNK), pl.ds(e0, ed_t)]   # (T, E)
            dx_c = dx_scr[pl.ds(t0, T_CHUNK), pl.ds(e0, ed_t)]     # (T, E)
            a_t = a_neg[:, e0:e0 + ed_t]                           # (N, E)

            # per sub-chunk / per tile only (never full (L, N, ED))
            decay = jnp.exp(d_c[:, None, :] * a_t[None, :, :])     # (T, N, E)
            bx = b_c[:, :, None] * dx_c[:, None, :]                # (T, N, E)

            h = h_scr[:, pl.ds(e0, ed_t)]                          # (N, E)
            hs = []
            for tau in range(T_CHUNK):       # serial part: h update only
                h = decay[tau] * h + bx[tau]
                hs.append(h[None])
            h_scr[:, pl.ds(e0, ed_t)] = h

            hs_all = jnp.concatenate(hs, axis=0)                   # (T, N, E)
            # one per-sub-chunk contraction: VPU mul + sublane reduce over N
            y_tile = jnp.sum(c_c[:, :, None] * hs_all, axis=1)     # (T, E)
            cur = y_scr[pl.ds(t0, T_CHUNK), pl.ds(e0, ed_t)]
            y_scr[pl.ds(t0, T_CHUNK), pl.ds(e0, ed_t)] = cur + y_tile

    # ---- gate, out_proj, residual ----
    z = jax.lax.dot_general(xn_b, wiz_ref[...], _CDIMS_T,
                            preferred_element_type=f32)        # (LC, ED)
    out = (y_scr[...] * _silu(z)).astype(bf16)
    o = jax.lax.dot_general(out, wout_ref[...], _CDIMS_T,
                            preferred_element_type=f32)        # (LC, D)
    o_ref[0] = (o + x).astype(o_ref.dtype)


def lm_head_kernel(x_ref, normw_ref, emb_ref, o_ref, xn_scr):
    # Fused final RMSNorm + tied lm_head tile: (tm, D) x (tn, D) -> (tm, tn).
    # The normalized activations are cached and reused across vocab tiles.
    @pl.when(pl.program_id(1) == 0)
    def _():
        x = x_ref[...]                                         # (tm, D) f32
        ms = jnp.mean(x * x, axis=-1, keepdims=True)
        xn_scr[...] = (x * jax.lax.rsqrt(ms + 1e-5)
                       * normw_ref[...]).astype(jnp.bfloat16)
    o_ref[...] = jax.lax.dot_general(xn_scr[...], emb_ref[...], _CDIMS_T,
                                     preferred_element_type=jnp.float32)


# ----------------------------- wrappers ---------------------------------------

def mamba_block(x, layer):
    """x: (B, L, D) residual stream -> norm -> mixer -> +residual, (B, L, D)."""
    B, L, D = x.shape
    ED = layer['in_proj_x'].shape[0]
    N = layer['A_log'].shape[0]
    K = layer['conv_w'].shape[0]
    assert L % T_CHUNK == 0, "sequence length must be a multiple of 8"
    LC = _pick_tile(L, L_CHUNK_TARGET, T_CHUNK)
    n_lc = L // LC

    weights = (layer['norm_w'], layer['in_proj_x'], layer['in_proj_z'],
               layer['conv_w'], layer['conv_b'],
               layer['x_proj_dt'], layer['x_proj_BC'],
               layer['dt_w'], layer['dt_b'], layer['A_log'], layer['D'],
               layer['out_proj'])

    def full_spec(a):
        nd = a.ndim
        return pl.BlockSpec(a.shape, lambda b, c, _nd=nd: (0,) * _nd)

    return pl.pallas_call(
        mamba_block_kernel,
        out_shape=jax.ShapeDtypeStruct((B, L, D), jnp.float32),
        grid=(B, n_lc),
        in_specs=[pl.BlockSpec((1, LC, D), lambda b, c: (b, c, 0))]
                 + [full_spec(w) for w in weights],
        out_specs=pl.BlockSpec((1, LC, D), lambda b, c: (b, c, 0)),
        scratch_shapes=[
            pltpu.VMEM((LC, ED), jnp.float32),       # delta
            pltpu.VMEM((LC, ED), jnp.float32),       # delta * x_conv
            pltpu.VMEM((LC, 2 * N), jnp.float32),    # B(t) | C(t)
            pltpu.VMEM((LC, ED), jnp.float32),       # y accumulator (incl. D*x)
            pltpu.VMEM((N, ED), jnp.float32),        # scan state h (carried)
            pltpu.VMEM((K - 1, ED), jnp.float32),    # conv-input carry rows
        ],
        compiler_params=pltpu.CompilerParams(
            dimension_semantics=("parallel", "arbitrary"),
            vmem_limit_bytes=VMEM_LIMIT_BYTES),
    )(x, *weights)


def lm_head(x2d, norm_w, emb, *, tm=256, tn=512):
    """Fused final RMSNorm + tied lm_head: (M, D) -> (M, V), tiled over (M, V)."""
    M, D = x2d.shape
    V = emb.shape[0]
    tm = _pick_tile(M, tm, 8)
    tn = _pick_tile(V, tn, 128)
    return pl.pallas_call(
        lm_head_kernel,
        out_shape=jax.ShapeDtypeStruct((M, V), jnp.float32),
        grid=(M // tm, V // tn),
        in_specs=[pl.BlockSpec((tm, D), lambda i, j: (i, 0)),
                  pl.BlockSpec((1, D), lambda i, j: (0, 0)),
                  pl.BlockSpec((tn, D), lambda i, j: (j, 0))],
        out_specs=pl.BlockSpec((tm, tn), lambda i, j: (i, j)),
        scratch_shapes=[pltpu.VMEM((tm, D), jnp.bfloat16)],
        compiler_params=pltpu.CompilerParams(
            dimension_semantics=("parallel", "arbitrary"),
            vmem_limit_bytes=VMEM_LIMIT_BYTES),
    )(x2d, norm_w, emb)


def mamba_lm_forward(tokens, params):
    """tokens: (B, L) int32 -> logits (B, L, vocab)."""
    emb = params['embedding']                        # (V, D) bf16 (tied lm_head)
    B, L = tokens.shape
    V, D = emb.shape

    x = emb[tokens].astype(jnp.float32)              # (B, L, D) plain-JAX gather

    for layer in params['layers']:
        x = mamba_block(x, layer)                    # norm + mixer + residual fused

    logits = lm_head(x.reshape(B * L, D), params['norm_f_w'], emb)
    return logits.reshape(B, L, V)


# ----------------------------- deterministic parameter init -------------------

def init_params(key, *, vocab_size, d_model, n_layers, d_state=16,
                expand=2, d_conv=4, dt_min=0.001, dt_max=0.1):
    # pad vocab to multiple of 8 (MambaLMConfig.__post_init__)
    pad = 8
    if vocab_size % pad != 0:
        vocab_size += pad - vocab_size % pad
    d_inner = expand * d_model
    dt_rank = math.ceil(d_model / 16)

    keys = jax.random.split(key, 2 + 8 * n_layers)
    ki = iter(range(len(keys)))
    bf16 = jnp.bfloat16

    def nrm(k, shape, scale, dtype=jnp.float32):
        return (jax.random.normal(keys[k], shape, jnp.float32) * scale).astype(dtype)

    params = {
        'embedding': nrm(next(ki), (vocab_size, d_model), 0.02, bf16),
        'norm_f_w': jnp.ones((1, d_model), jnp.float32),
        'layers': [],
    }

    for _ in range(n_layers):
        layer = {}
        layer['norm_w'] = jnp.ones((1, d_model), jnp.float32)
        w_in = nrm(next(ki), (2 * d_inner, d_model), 1.0 / math.sqrt(d_model))
        layer['in_proj_x'] = w_in[:d_inner].astype(bf16)       # (ED, D)
        layer['in_proj_z'] = w_in[d_inner:].astype(bf16)       # (ED, D)
        # conv weight stored (K, ED): taps on sublanes, channels on lanes
        layer['conv_w'] = nrm(next(ki), (d_conv, d_inner), 1.0 / math.sqrt(d_conv))
        layer['conv_b'] = nrm(next(ki), (1, d_inner), 0.02)
        w_x = nrm(next(ki), (dt_rank + 2 * d_state, d_inner), 1.0 / math.sqrt(d_inner))
        layer['x_proj_dt'] = w_x[:dt_rank].astype(bf16)        # (dt_rank, ED)
        layer['x_proj_BC'] = w_x[dt_rank:].astype(bf16)        # (2N, ED) merged B|C
        layer['dt_w'] = nrm(next(ki), (d_inner, dt_rank), 1.0 / math.sqrt(dt_rank))
        # dt bias: inverse-softplus of dt uniform in [dt_min, dt_max] (log space)
        u = jax.random.uniform(keys[next(ki)], (1, d_inner), jnp.float32)
        dt = jnp.exp(u * (math.log(dt_max) - math.log(dt_min)) + math.log(dt_min))
        dt = jnp.clip(dt, 1e-4, None)
        layer['dt_b'] = dt + jnp.log(-jnp.expm1(-dt))
        # A_log stored (N, ED) so the scan is lane-dense over ED (S4D-real init)
        layer['A_log'] = jnp.log(
            jnp.tile(jnp.arange(1, d_state + 1, dtype=jnp.float32)[:, None],
                     (1, d_inner)))
        layer['D'] = jnp.ones((1, d_inner), jnp.float32)
        layer['out_proj'] = nrm(next(ki), (d_model, d_inner),
                                1.0 / math.sqrt(d_inner), bf16)            # (D, ED)
        _ = next(ki)  # keep key consumption per layer fixed
        params['layers'].append(layer)

    return params, vocab_size


# ----------------------------- main -------------------------------------------

if __name__ == "__main__":
    B, L = 2, 8
    d_model = 32
    n_layers = 2
    vocab_size = 512          # small vocab (already multiple of 8)

    key = jax.random.PRNGKey(0)
    pkey, tkey = jax.random.split(key)
    params, vocab_size = init_params(pkey, vocab_size=vocab_size,
                                     d_model=d_model, n_layers=n_layers)

    tokens = jax.random.randint(tkey, (B, L), 0, vocab_size, dtype=jnp.int32)

    logits = mamba_lm_forward(tokens, params)
    logits = jax.block_until_ready(logits)

    assert logits.shape == (B, L, vocab_size), logits.shape
    assert bool(jnp.all(jnp.isfinite(logits)))
    print("KERNEL_OK")
</pallas_src>

<mosaic_0001>
module attributes {stable_mosaic.version = 11 : i64} {
  func.func @mamba_block_kernel(%arg0: i32, %arg1: i32, %arg2: memref<1x8x32xf32, #tpu.memory_space<vmem>>, %arg3: memref<1x32xf32, #tpu.memory_space<vmem>>, %arg4: memref<64x32xbf16, #tpu.memory_space<vmem>>, %arg5: memref<64x32xbf16, #tpu.memory_space<vmem>>, %arg6: memref<4x64xf32, #tpu.memory_space<vmem>>, %arg7: memref<1x64xf32, #tpu.memory_space<vmem>>, %arg8: memref<2x64xbf16, #tpu.memory_space<vmem>>, %arg9: memref<32x64xbf16, #tpu.memory_space<vmem>>, %arg10: memref<64x2xf32, #tpu.memory_space<vmem>>, %arg11: memref<1x64xf32, #tpu.memory_space<vmem>>, %arg12: memref<16x64xf32, #tpu.memory_space<vmem>>, %arg13: memref<1x64xf32, #tpu.memory_space<vmem>>, %arg14: memref<32x64xbf16, #tpu.memory_space<vmem>>, %arg15: memref<1x8x32xf32, #tpu.memory_space<vmem>>, %arg16: memref<8x64xf32, #tpu.memory_space<vmem>>, %arg17: memref<8x64xf32, #tpu.memory_space<vmem>>, %arg18: memref<8x32xf32, #tpu.memory_space<vmem>>, %arg19: memref<8x64xf32, #tpu.memory_space<vmem>>, %arg20: memref<16x64xf32, #tpu.memory_space<vmem>>, %arg21: memref<3x64xf32, #tpu.memory_space<vmem>>) attributes {dimension_semantics = [#tpu.dimension_semantics<parallel>, #tpu.dimension_semantics<arbitrary>], iteration_bounds = array<i64: 2, 1>, scalar_prefetch = 0 : i64, scratch_operands = 6 : i64, tpu.core_type = #tpu.core_type<tc>, window_params = [{transform_indices = @transform_0, window_bounds = array<i64: 1, 8, 32>}, {pipeline_mode = #tpu.pipeline_mode<synchronous>, transform_indices = @transform_1, window_bounds = array<i64: 1, 32>}, {pipeline_mode = #tpu.pipeline_mode<synchronous>, transform_indices = @transform_2, window_bounds = array<i64: 64, 32>}, {pipeline_mode = #tpu.pipeline_mode<synchronous>, transform_indices = @transform_3, window_bounds = array<i64: 64, 32>}, {pipeline_mode = #tpu.pipeline_mode<synchronous>, transform_indices = @transform_4, window_bounds = array<i64: 4, 64>}, {pipeline_mode = #tpu.pipeline_mode<synchronous>, transform_indices = @transform_5, window_bounds = array<i64: 1, 64>}, {pipeline_mode = #tpu.pipeline_mode<synchronous>, transform_indices = @transform_6, window_bounds = array<i64: 2, 64>}, {pipeline_mode = #tpu.pipeline_mode<synchronous>, transform_indices = @transform_7, window_bounds = array<i64: 32, 64>}, {pipeline_mode = #tpu.pipeline_mode<synchronous>, transform_indices = @transform_8, window_bounds = array<i64: 64, 2>}, {pipeline_mode = #tpu.pipeline_mode<synchronous>, transform_indices = @transform_9, window_bounds = array<i64: 1, 64>}, {pipeline_mode = #tpu.pipeline_mode<synchronous>, transform_indices = @transform_10, window_bounds = array<i64: 16, 64>}, {pipeline_mode = #tpu.pipeline_mode<synchronous>, transform_indices = @transform_11, window_bounds = array<i64: 1, 64>}, {pipeline_mode = #tpu.pipeline_mode<synchronous>, transform_indices = @transform_12, window_bounds = array<i64: 32, 64>}, {transform_indices = @transform_13, window_bounds = array<i64: 1, 8, 32>}]} {
    %c0 = arith.constant 0 : index
    %c0_0 = arith.constant 0 : index
    %c0_1 = arith.constant 0 : index
    %0 = vector.load %arg2[%c0, %c0_0, %c0_1] : memref<1x8x32xf32, #tpu.memory_space<vmem>>, vector<1x8x32xf32>
    %1 = vector.shape_cast %0 : vector<1x8x32xf32> to vector<8x32xf32>
    %c0_i32 = arith.constant 0 : i32
    %2 = arith.cmpi eq, %arg1, %c0_i32 : i32
    %3 = arith.extui %2 : i1 to i32
    %c0_i32_2 = arith.constant 0 : i32
    %4 = arith.cmpi ne, %3, %c0_i32_2 : i32
    scf.if %4 {
      %cst_75 = arith.constant 0.000000e+00 : f32
      %199 = vector.broadcast %cst_75 : f32 to vector<16x64xf32>
      %c0_76 = arith.constant 0 : index
      %c0_77 = arith.constant 0 : index
      %200 = vector.load %arg20[%c0_76, %c0_77] : memref<16x64xf32, #tpu.memory_space<vmem>>, vector<16x64xf32>
      tpu.vector_store %arg20[%c0_76, %c0_77], %199 {strides = array<i32>} : memref<16x64xf32, #tpu.memory_space<vmem>>, vector<16x64xf32>,
      %cst_78 = arith.constant 0.000000e+00 : f32
      %201 = vector.broadcast %cst_78 : f32 to vector<3x64xf32>
      %c0_79 = arith.constant 0 : index
      %c0_80 = arith.constant 0 : index
      %202 = vector.load %arg21[%c0_79, %c0_80] : memref<3x64xf32, #tpu.memory_space<vmem>>, vector<3x64xf32>
      tpu.vector_store %arg21[%c0_79, %c0_80], %201 {strides = array<i32>} : memref<3x64xf32, #tpu.memory_space<vmem>>, vector<3x64xf32>,
    } else {
    }
    %5 = arith.mulf %1, %1 : vector<8x32xf32>
    %cst = arith.constant dense<0.000000e+00> : vector<8xf32>
    %6 = vector.multi_reduction <add>, %5, %cst [1] : vector<8x32xf32> to vector<8xf32>
    %7 = vector.shape_cast %6 : vector<8xf32> to vector<8x1xf32>
    %cst_3 = arith.constant 3.200000e+01 : f32
    %8 = vector.broadcast %cst_3 : f32 to vector<8x1xf32>
    %9 = arith.divf %7, %8 : vector<8x1xf32>
    %cst_4 = arith.constant 9.99999974E-6 : f32
    %10 = vector.broadcast %cst_4 : f32 to vector<8x1xf32>
    %11 = arith.addf %9, %10 : vector<8x1xf32>
    %12 = math.rsqrt %11 : vector<8x1xf32>
    %13 = vector.broadcast %12 : vector<8x1xf32> to vector<8x32xf32>
    %14 = arith.mulf %1, %13 : vector<8x32xf32>
    %c0_5 = arith.constant 0 : index
    %c0_6 = arith.constant 0 : index
    %15 = vector.load %arg3[%c0_5, %c0_6] : memref<1x32xf32, #tpu.memory_space<vmem>>, vector<1x32xf32>
    %16 = vector.broadcast %15 : vector<1x32xf32> to vector<8x32xf32>
    %17 = arith.mulf %14, %16 : vector<8x32xf32>
    %18 = arith.truncf %17 : vector<8x32xf32> to vector<8x32xbf16>
    %c0_7 = arith.constant 0 : index
    %c0_8 = arith.constant 0 : index
    %19 = vector.load %arg4[%c0_7, %c0_8] : memref<64x32xbf16, #tpu.memory_space<vmem>>, vector<64x32xbf16>
    %cst_9 = arith.constant dense<0.000000e+00> : vector<8x64xf32>
    %20 = tpu.matmul %18, %19, %cst_9 {dimension_numbers = #tpu.dot_dimension_numbers<[1], [1], [0], [0], [0, 0, 1, 0], [], []>} : vector<8x32xbf16>, vector<64x32xbf16>, vector<8x64xf32> -> vector<8x64xf32>
    %c0_10 = arith.constant 0 : index
    %c0_11 = arith.constant 0 : index
    %21 = vector.load %arg21[%c0_10, %c0_11] : memref<3x64xf32, #tpu.memory_space<vmem>>, vector<3x64xf32>
    %22 = vector.extract_strided_slice %20 {offsets = [5, 0], sizes = [3, 64], strides = [1, 1]} : vector<8x64xf32> to vector<3x64xf32>
    %c0_12 = arith.constant 0 : index
    %c0_13 = arith.constant 0 : index
    %23 = vector.load %arg21[%c0_12, %c0_13] : memref<3x64xf32, #tpu.memory_space<vmem>>, vector<3x64xf32>
    tpu.vector_store %arg21[%c0_12, %c0_13], %22 {strides = array<i32>} : memref<3x64xf32, #tpu.memory_space<vmem>>, vector<3x64xf32>,
    %24 = tpu.concatenate %21, %20 in 0 : vector<3x64xf32>, vector<8x64xf32> -> vector<11x64xf32>
    %c0_14 = arith.constant 0 : index
    %c0_15 = arith.constant 0 : index
    %25 = vector.load %arg6[%c0_14, %c0_15] : memref<4x64xf32, #tpu.memory_space<vmem>>, vector<4x64xf32>
    %c0_16 = arith.constant 0 : index
    %c0_17 = arith.constant 0 : index
    %26 = vector.load %arg7[%c0_16, %c0_17] : memref<1x64xf32, #tpu.memory_space<vmem>>, vector<1x64xf32>
    %27 = vector.shape_cast %26 : vector<1x64xf32> to vector<1x64xf32>
    %28 = vector.broadcast %27 : vector<1x64xf32> to vector<8x64xf32>
    %29 = vector.extract_strided_slice %24 {offsets = [0, 0], sizes = [8, 64], strides = [1, 1]} : vector<11x64xf32> to vector<8x64xf32>
    %30 = vector.extract_strided_slice %25 {offsets = [0, 0], sizes = [1, 64], strides = [1, 1]} : vector<4x64xf32> to vector<1x64xf32>
    %31 = vector.broadcast %30 : vector<1x64xf32> to vector<8x64xf32>
    %32 = arith.mulf %29, %31 : vector<8x64xf32>
    %33 = arith.addf %28, %32 : vector<8x64xf32>
    %34 = vector.extract_strided_slice %24 {offsets = [1, 0], sizes = [8, 64], strides = [1, 1]} : vector<11x64xf32> to vector<8x64xf32>
    %35 = vector.extract_strided_slice %25 {offsets = [1, 0], sizes = [1, 64], strides = [1, 1]} : vector<4x64xf32> to vector<1x64xf32>
    %36 = vector.broadcast %35 : vector<1x64xf32> to vector<8x64xf32>
    %37 = arith.mulf %34, %36 : vector<8x64xf32>
    %38 = arith.addf %33, %37 : vector<8x64xf32>
    %39 = vector.extract_strided_slice %24 {offsets = [2, 0], sizes = [8, 64], strides = [1, 1]} : vector<11x64xf32> to vector<8x64xf32>
    %40 = vector.extract_strided_slice %25 {offsets = [2, 0], sizes = [1, 64], strides = [1, 1]} : vector<4x64xf32> to vector<1x64xf32>
    %41 = vector.broadcast %40 : vector<1x64xf32> to vector<8x64xf32>
    %42 = arith.mulf %39, %41 : vector<8x64xf32>
    %43 = arith.addf %38, %42 : vector<8x64xf32>
    %44 = vector.extract_strided_slice %24 {offsets = [3, 0], sizes = [8, 64], strides = [1, 1]} : vector<11x64xf32> to vector<8x64xf32>
    %45 = vector.extract_strided_slice %25 {offsets = [3, 0], sizes = [1, 64], strides = [1, 1]} : vector<4x64xf32> to vector<1x64xf32>
    %46 = vector.broadcast %45 : vector<1x64xf32> to vector<8x64xf32>
    %47 = arith.mulf %44, %46 : vector<8x64xf32>
    %48 = arith.addf %43, %47 : vector<8x64xf32>
    %cst_18 = arith.constant 0.000000e+00 : f32
    %49 = vector.broadcast %cst_18 : f32 to vector<8x64xf32>
    %50 = arith.subf %49, %48 : vector<8x64xf32>
    %51 = math.exp %50 : vector<8x64xf32>
    %cst_19 = arith.constant 1.000000e+00 : f32
    %52 = vector.broadcast %cst_19 : f32 to vector<8x64xf32>
    %53 = arith.addf %52, %51 : vector<8x64xf32>
    %cst_20 = arith.constant 1.000000e+00 : f32
    %54 = vector.broadcast %cst_20 : f32 to vector<8x64xf32>
    %55 = arith.divf %54, %53 : vector<8x64xf32>
    %56 = arith.mulf %48, %55 : vector<8x64xf32>
    %57 = arith.truncf %56 : vector<8x64xf32> to vector<8x64xbf16>
    %c0_21 = arith.constant 0 : index
    %c0_22 = arith.constant 0 : index
    %58 = vector.load %arg8[%c0_21, %c0_22] : memref<2x64xbf16, #tpu.memory_space<vmem>>, vector<2x64xbf16>
    %cst_23 = arith.constant dense<0.000000e+00> : vector<8x2xf32>
    %59 = tpu.matmul %57, %58, %cst_23 {dimension_numbers = #tpu.dot_dimension_numbers<[1], [1], [0], [0], [0, 0, 1, 0], [], []>} : vector<8x64xbf16>, vector<2x64xbf16>, vector<8x2xf32> -> vector<8x2xf32>
    %c0_24 = arith.constant 0 : index
    %c0_25 = arith.constant 0 : index
    %60 = vector.load %arg9[%c0_24, %c0_25] : memref<32x64xbf16, #tpu.memory_space<vmem>>, vector<32x64xbf16>
    %cst_26 = arith.constant dense<0.000000e+00> : vector<8x32xf32>
    %61 = tpu.matmul %57, %60, %cst_26 {dimension_numbers = #tpu.dot_dimension_numbers<[1], [1], [0], [0], [0, 0, 1, 0], [], []>} : vector<8x64xbf16>, vector<32x64xbf16>, vector<8x32xf32> -> vector<8x32xf32>
    %c0_27 = arith.constant 0 : index
    %c0_28 = arith.constant 0 : index
    %62 = vector.load %arg10[%c0_27, %c0_28] : memref<64x2xf32, #tpu.memory_space<vmem>>, vector<64x2xf32>
    %cst_29 = arith.constant dense<0.000000e+00> : vector<8x64xf32>
    %63 = tpu.matmul %59, %62, %cst_29 {dimension_numbers = #tpu.dot_dimension_numbers<[1], [1], [0], [0], [0, 0, 1, 0], [], []>} : vector<8x2xf32>, vector<64x2xf32>, vector<8x64xf32> -> vector<8x64xf32>
    %c0_30 = arith.constant 0 : index
    %c0_31 = arith.constant 0 : index
    %64 = vector.load %arg11[%c0_30, %c0_31] : memref<1x64xf32, #tpu.memory_space<vmem>>, vector<1x64xf32>
    %65 = vector.broadcast %64 : vector<1x64xf32> to vector<8x64xf32>
    %66 = arith.addf %63, %65 : vector<8x64xf32>
    %cst_32 = arith.constant 0.000000e+00 : f32
    %67 = vector.broadcast %cst_32 : f32 to vector<8x64xf32>
    %68 = arith.maximumf %66, %67 : vector<8x64xf32>
    %69 = math.absf %66 : vector<8x64xf32>
    %cst_33 = arith.constant 0.000000e+00 : f32
    %70 = vector.broadcast %cst_33 : f32 to vector<8x64xf32>
    %71 = arith.subf %70, %69 : vector<8x64xf32>
    %72 = math.exp %71 : vector<8x64xf32>
    %cst_34 = arith.constant 1.000000e+00 : f32
    %73 = vector.broadcast %cst_34 : f32 to vector<8x64xf32>
    %74 = arith.addf %73, %72 : vector<8x64xf32>
    %75 = math.log %74 : vector<8x64xf32>
    %76 = arith.addf %68, %75 : vector<8x64xf32>
    %c0_35 = arith.constant 0 : index
    %c0_36 = arith.constant 0 : index
    %77 = vector.load %arg16[%c0_35, %c0_36] : memref<8x64xf32, #tpu.memory_space<vmem>>, vector<8x64xf32>
    tpu.vector_store %arg16[%c0_35, %c0_36], %76 {strides = array<i32>} : memref<8x64xf32, #tpu.memory_space<vmem>>, vector<8x64xf32>,
    %78 = arith.mulf %76, %56 : vector<8x64xf32>
    %c0_37 = arith.constant 0 : index
    %c0_38 = arith.constant 0 : index
    %79 = vector.load %arg17[%c0_37, %c0_38] : memref<8x64xf32, #tpu.memory_space<vmem>>, vector<8x64xf32>
    tpu.vector_store %arg17[%c0_37, %c0_38], %78 {strides = array<i32>} : memref<8x64xf32, #tpu.memory_space<vmem>>, vector<8x64xf32>,
    %c0_39 = arith.constant 0 : index
    %c0_40 = arith.constant 0 : index
    %80 = vector.load %arg18[%c0_39, %c0_40] : memref<8x32xf32, #tpu.memory_space<vmem>>, vector<8x32xf32>
    tpu.vector_store %arg18[%c0_39, %c0_40], %61 {strides = array<i32>} : memref<8x32xf32, #tpu.memory_space<vmem>>, vector<8x32xf32>,
    %c0_41 = arith.constant 0 : index
    %c0_42 = arith.constant 0 : index
    %81 = vector.load %arg13[%c0_41, %c0_42] : memref<1x64xf32, #tpu.memory_space<vmem>>, vector<1x64xf32>
    %82 = vector.broadcast %81 : vector<1x64xf32> to vector<8x64xf32>
    %83 = arith.mulf %82, %56 : vector<8x64xf32>
    %c0_43 = arith.constant 0 : index
    %c0_44 = arith.constant 0 : index
    %84 = vector.load %arg19[%c0_43, %c0_44] : memref<8x64xf32, #tpu.memory_space<vmem>>, vector<8x64xf32>
    tpu.vector_store %arg19[%c0_43, %c0_44], %83 {strides = array<i32>} : memref<8x64xf32, #tpu.memory_space<vmem>>, vector<8x64xf32>,
    %c0_45 = arith.constant 0 : index
    %c0_46 = arith.constant 0 : index
    %85 = vector.load %arg12[%c0_45, %c0_46] : memref<16x64xf32, #tpu.memory_space<vmem>>, vector<16x64xf32>
    %86 = math.exp %85 : vector<16x64xf32>
    %cst_47 = arith.constant 0.000000e+00 : f32
    %87 = vector.broadcast %cst_47 : f32 to vector<16x64xf32>
    %88 = arith.subf %87, %86 : vector<16x64xf32>
    %c0_i32_48 = arith.constant 0 : i32
    %c1_i32 = arith.constant 1 : i32
    %89 = arith.muli %c0_i32_48, %c1_i32 : i32
    %c0_i32_49 = arith.constant 0 : i32
    %90 = arith.addi %c0_i32_49, %89 : i32
    %c8_i32 = arith.constant 8 : i32
    %91 = arith.muli %90, %c8_i32 : i32
    %92 = tpu.assume_multiple %91, 8 : i32
    %93 = arith.index_cast %92 : i32 to index
    %c0_50 = arith.constant 0 : index
    %94 = vector.load %arg18[%93, %c0_50] : memref<8x32xf32, #tpu.memory_space<vmem>>, vector<8x32xf32>
    %95 = vector.extract_strided_slice %94 {offsets = [0, 0], sizes = [8, 16], strides = [1, 1]} : vector<8x32xf32> to vector<8x16xf32>
    %96 = vector.extract_strided_slice %94 {offsets = [0, 16], sizes = [8, 16], strides = [1, 1]} : vector<8x32xf32> to vector<8x16xf32>
    %97 = arith.index_cast %92 : i32 to index
    %c0_51 = arith.constant 0 : index
    %98 = vector.load %arg16[%97, %c0_51] : memref<8x64xf32, #tpu.memory_space<vmem>>, vector<8x64xf32>
    %99 = arith.index_cast %92 : i32 to index
    %c0_52 = arith.constant 0 : index
    %100 = vector.load %arg17[%99, %c0_52] : memref<8x64xf32, #tpu.memory_space<vmem>>, vector<8x64xf32>
    %101 = vector.shape_cast %98 : vector<8x64xf32> to vector<8x1x64xf32>
    %102 = vector.shape_cast %88 : vector<16x64xf32> to vector<1x16x64xf32>
    %103 = vector.broadcast %101 : vector<8x1x64xf32> to vector<8x16x64xf32>
    %104 = vector.broadcast %102 : vector<1x16x64xf32> to vector<8x16x64xf32>
    %105 = arith.mulf %103, %104 : vector<8x16x64xf32>
    %106 = math.exp %105 : vector<8x16x64xf32>
    %107 = vector.shape_cast %95 : vector<8x16xf32> to vector<8x16x1xf32>
    %108 = vector.shape_cast %100 : vector<8x64xf32> to vector<8x1x64xf32>
    %109 = vector.broadcast %107 : vector<8x16x1xf32> to vector<8x16x64xf32>
    %110 = vector.broadcast %108 : vector<8x1x64xf32> to vector<8x16x64xf32>
    %111 = arith.mulf %109, %110 : vector<8x16x64xf32>
    %c0_53 = arith.constant 0 : index
    %c0_54 = arith.constant 0 : index
    %112 = vector.load %arg20[%c0_53, %c0_54] : memref<16x64xf32, #tpu.memory_space<vmem>>, vector<16x64xf32>
    %113 = vector.extract_strided_slice %106 {offsets = [0, 0, 0], sizes = [1, 16, 64], strides = [1, 1, 1]} : vector<8x16x64xf32> to vector<1x16x64xf32>
    %114 = vector.shape_cast %113 : vector<1x16x64xf32> to vector<16x64xf32>
    %115 = arith.mulf %114, %112 : vector<16x64xf32>
    %116 = vector.extract_strided_slice %111 {offsets = [0, 0, 0], sizes = [1, 16, 64], strides = [1, 1, 1]} : vector<8x16x64xf32> to vector<1x16x64xf32>
    %117 = vector.shape_cast %116 : vector<1x16x64xf32> to vector<16x64xf32>
    %118 = arith.addf %115, %117 : vector<16x64xf32>
    %119 = vector.shape_cast %118 : vector<16x64xf32> to vector<1x16x64xf32>
    %120 = vector.extract_strided_slice %106 {offsets = [1, 0, 0], sizes = [1, 16, 64], strides = [1, 1, 1]} : vector<8x16x64xf32> to vector<1x16x64xf32>
    %121 = vector.shape_cast %120 : vector<1x16x64xf32> to vector<16x64xf32>
    %122 = arith.mulf %121, %118 : vector<16x64xf32>
    %123 = vector.extract_strided_slice %111 {offsets = [1, 0, 0], sizes = [1, 16, 64], strides = [1, 1, 1]} : vector<8x16x64xf32> to vector<1x16x64xf32>
    %124 = vector.shape_cast %123 : vector<1x16x64xf32> to vector<16x64xf32>
    %125 = arith.addf %122, %124 : vector<16x64xf32>
    %126 = vector.shape_cast %125 : vector<16x64xf32> to vector<1x16x64xf32>
    %127 = vector.extract_strided_slice %106 {offsets = [2, 0, 0], sizes = [1, 16, 64], strides = [1, 1, 1]} : vector<8x16x64xf32> to vector<1x16x64xf32>
    %128 = vector.shape_cast %127 : vector<1x16x64xf32> to vector<16x64xf32>
    %129 = arith.mulf %128, %125 : vector<16x64xf32>
    %130 = vector.extract_strided_slice %111 {offsets = [2, 0, 0], sizes = [1, 16, 64], strides = [1, 1, 1]} : vector<8x16x64xf32> to vector<1x16x64xf32>
    %131 = vector.shape_cast %130 : vector<1x16x64xf32> to vector<16x64xf32>
    %132 = arith.addf %129, %131 : vector<16x64xf32>
    %133 = vector.shape_cast %132 : vector<16x64xf32> to vector<1x16x64xf32>
    %134 = vector.extract_strided_slice %106 {offsets = [3, 0, 0], sizes = [1, 16, 64], strides = [1, 1, 1]} : vector<8x16x64xf32> to vector<1x16x64xf32>
    %135 = vector.shape_cast %134 : vector<1x16x64xf32> to vector<16x64xf32>
    %136 = arith.mulf %135, %132 : vector<16x64xf32>
    %137 = vector.extract_strided_slice %111 {offsets = [3, 0, 0], sizes = [1, 16, 64], strides = [1, 1, 1]} : vector<8x16x64xf32> to vector<1x16x64xf32>
    %138 = vector.shape_cast %137 : vector<1x16x64xf32> to vector<16x64xf32>
    %139 = arith.addf %136, %138 : vector<16x64xf32>
    %140 = vector.shape_cast %139 : vector<16x64xf32> to vector<1x16x64xf32>
    %141 = vector.extract_strided_slice %106 {offsets = [4, 0, 0], sizes = [1, 16, 64], strides = [1, 1, 1]} : vector<8x16x64xf32> to vector<1x16x64xf32>
    %142 = vector.shape_cast %141 : vector<1x16x64xf32> to vector<16x64xf32>
    %143 = arith.mulf %142, %139 : vector<16x64xf32>
    %144 = vector.extract_strided_slice %111 {offsets = [4, 0, 0], sizes = [1, 16, 64], strides = [1, 1, 1]} : vector<8x16x64xf32> to vector<1x16x64xf32>
    %145 = vector.shape_cast %144 : vector<1x16x64xf32> to vector<16x64xf32>
    %146 = arith.addf %143, %145 : vector<16x64xf32>
    %147 = vector.shape_cast %146 : vector<16x64xf32> to vector<1x16x64xf32>
    %148 = vector.extract_strided_slice %106 {offsets = [5, 0, 0], sizes = [1, 16, 64], strides = [1, 1, 1]} : vector<8x16x64xf32> to vector<1x16x64xf32>
    %149 = vector.shape_cast %148 : vector<1x16x64xf32> to vector<16x64xf32>
    %150 = arith.mulf %149, %146 : vector<16x64xf32>
    %151 = vector.extract_strided_slice %111 {offsets = [5, 0, 0], sizes = [1, 16, 64], strides = [1, 1, 1]} : vector<8x16x64xf32> to vector<1x16x64xf32>
    %152 = vector.shape_cast %151 : vector<1x16x64xf32> to vector<16x64xf32>
    %153 = arith.addf %150, %152 : vector<16x64xf32>
    %154 = vector.shape_cast %153 : vector<16x64xf32> to vector<1x16x64xf32>
    %155 = vector.extract_strided_slice %106 {offsets = [6, 0, 0], sizes = [1, 16, 64], strides = [1, 1, 1]} : vector<8x16x64xf32> to vector<1x16x64xf32>
    %156 = vector.shape_cast %155 : vector<1x16x64xf32> to vector<16x64xf32>
    %157 = arith.mulf %156, %153 : vector<16x64xf32>
    %158 = vector.extract_strided_slice %111 {offsets = [6, 0, 0], sizes = [1, 16, 64], strides = [1, 1, 1]} : vector<8x16x64xf32> to vector<1x16x64xf32>
    %159 = vector.shape_cast %158 : vector<1x16x64xf32> to vector<16x64xf32>
    %160 = arith.addf %157, %159 : vector<16x64xf32>
    %161 = vector.shape_cast %160 : vector<16x64xf32> to vector<1x16x64xf32>
    %162 = vector.extract_strided_slice %106 {offsets = [7, 0, 0], sizes = [1, 16, 64], strides = [1, 1, 1]} : vector<8x16x64xf32> to vector<1x16x64xf32>
    %163 = vector.shape_cast %162 : vector<1x16x64xf32> to vector<16x64xf32>
    %164 = arith.mulf %163, %160 : vector<16x64xf32>
    %165 = vector.extract_strided_slice %111 {offsets = [7, 0, 0], sizes = [1, 16, 64], strides = [1, 1, 1]} : vector<8x16x64xf32> to vector<1x16x64xf32>
    %166 = vector.shape_cast %165 : vector<1x16x64xf32> to vector<16x64xf32>
    %167 = arith.addf %164, %166 : vector<16x64xf32>
    %168 = vector.shape_cast %167 : vector<16x64xf32> to vector<1x16x64xf32>
    %c0_55 = arith.constant 0 : index
    %c0_56 = arith.constant 0 : index
    %169 = vector.load %arg20[%c0_55, %c0_56] : memref<16x64xf32, #tpu.memory_space<vmem>>, vector<16x64xf32>
    tpu.vector_store %arg20[%c0_55, %c0_56], %167 {strides = array<i32>} : memref<16x64xf32, #tpu.memory_space<vmem>>, vector<16x64xf32>,
    %170 = tpu.concatenate %119, %126, %133, %140, %147, %154, %161, %168 in 0 : vector<1x16x64xf32>, vector<1x16x64xf32>, vector<1x16x64xf32>, vector<1x16x64xf32>, vector<1x16x64xf32>, vector<1x16x64xf32>, vector<1x16x64xf32>, vector<1x16x64xf32> -> vector<8x16x64xf32>
    %171 = vector.shape_cast %96 : vector<8x16xf32> to vector<8x16x1xf32>
    %172 = vector.broadcast %171 : vector<8x16x1xf32> to vector<8x16x64xf32>
    %173 = arith.mulf %172, %170 : vector<8x16x64xf32>
    %cst_57 = arith.constant dense<0.000000e+00> : vector<8x64xf32>
    %174 = vector.multi_reduction <add>, %173, %cst_57 [1] : vector<8x16x64xf32> to vector<8x64xf32>
    %175 = arith.index_cast %92 : i32 to index
    %c0_58 = arith.constant 0 : index
    %176 = vector.load %arg19[%175, %c0_58] : memref<8x64xf32, #tpu.memory_space<vmem>>, vector<8x64xf32>
    %177 = arith.addf %176, %174 : vector<8x64xf32>
    %178 = arith.index_cast %92 : i32 to index
    %c0_59 = arith.constant 0 : index
    %179 = vector.load %arg19[%178, %c0_59] : memref<8x64xf32, #tpu.memory_space<vmem>>, vector<8x64xf32>
    tpu.vector_store %arg19[%178, %c0_59], %177 {strides = array<i32>} : memref<8x64xf32, #tpu.memory_space<vmem>>, vector<8x64xf32>,
    %c1_i32_60 = arith.constant 1 : i32
    %c0_61 = arith.constant 0 : index
    %c0_62 = arith.constant 0 : index
    %180 = vector.load %arg5[%c0_61, %c0_62] : memref<64x32xbf16, #tpu.memory_space<vmem>>, vector<64x32xbf16>
    %cst_63 = arith.constant dense<0.000000e+00> : vector<8x64xf32>
    %181 = tpu.matmul %18, %180, %cst_63 {dimension_numbers = #tpu.dot_dimension_numbers<[1], [1], [0], [0], [0, 0, 1, 0], [], []>} : vector<8x32xbf16>, vector<64x32xbf16>, vector<8x64xf32> -> vector<8x64xf32>
    %c0_64 = arith.constant 0 : index
    %c0_65 = arith.constant 0 : index
    %182 = vector.load %arg19[%c0_64, %c0_65] : memref<8x64xf32, #tpu.memory_space<vmem>>, vector<8x64xf32>
    %cst_66 = arith.constant 0.000000e+00 : f32
    %183 = vector.broadcast %cst_66 : f32 to vector<8x64xf32>
    %184 = arith.subf %183, %181 : vector<8x64xf32>
    %185 = math.exp %184 : vector<8x64xf32>
    %cst_67 = arith.constant 1.000000e+00 : f32
    %186 = vector.broadcast %cst_67 : f32 to vector<8x64xf32>
    %187 = arith.addf %186, %185 : vector<8x64xf32>
    %cst_68 = arith.constant 1.000000e+00 : f32
    %188 = vector.broadcast %cst_68 : f32 to vector<8x64xf32>
    %189 = arith.divf %188, %187 : vector<8x64xf32>
    %190 = arith.mulf %181, %189 : vector<8x64xf32>
    %191 = arith.mulf %182, %190 : vector<8x64xf32>
    %192 = arith.truncf %191 : vector<8x64xf32> to vector<8x64xbf16>
    %c0_69 = arith.constant 0 : index
    %c0_70 = arith.constant 0 : index
    %193 = vector.load %arg14[%c0_69, %c0_70] : memref<32x64xbf16, #tpu.memory_space<vmem>>, vector<32x64xbf16>
    %cst_71 = arith.constant dense<0.000000e+00> : vector<8x32xf32>
    %194 = tpu.matmul %192, %193, %cst_71 {dimension_numbers = #tpu.dot_dimension_numbers<[1], [1], [0], [0], [0, 0, 1, 0], [], []>} : vector<8x64xbf16>, vector<32x64xbf16>, vector<8x32xf32> -> vector<8x32xf32>
    %195 = arith.addf %194, %1 : vector<8x32xf32>
    %c0_72 = arith.constant 0 : index
    %c0_73 = arith.constant 0 : index
    %c0_74 = arith.constant 0 : index
    %196 = vector.load %arg15[%c0_72, %c0_73, %c0_74] : memref<1x8x32xf32, #tpu.memory_space<vmem>>, vector<1x8x32xf32>
    %197 = vector.shape_cast %196 : vector<1x8x32xf32> to vector<8x32xf32>
    %198 = vector.shape_cast %195 : vector<8x32xf32> to vector<1x8x32xf32>
    tpu.vector_store %arg15[%c0_72, %c0_73, %c0_74], %198 {strides = array<i32>} : memref<1x8x32xf32, #tpu.memory_space<vmem>>, vector<1x8x32xf32>,
    return
  }
  func.func @transform_0(%arg0: i32, %arg1: i32) -> (i32, i32, i32) {
    %c0_i32 = arith.constant 0 : i32
    %c0_i32_0 = arith.constant 0 : i32
    return %arg0, %arg1, %c0_i32 : i32, i32, i32
  }
  func.func @transform_1(%arg0: i32, %arg1: i32) -> (i32, i32) {
    %c0_i32 = arith.constant 0 : i32
    %c0_i32_0 = arith.constant 0 : i32
    %c0_i32_1 = arith.constant 0 : i32
    return %c0_i32, %c0_i32_0 : i32, i32
  }
  func.func @transform_2(%arg0: i32, %arg1: i32) -> (i32, i32) {
    %c0_i32 = arith.constant 0 : i32
    %c0_i32_0 = arith.constant 0 : i32
    %c0_i32_1 = arith.constant 0 : i32
    return %c0_i32, %c0_i32_0 : i32, i32
  }
  func.func @transform_3(%arg0: i32, %arg1: i32) -> (i32, i32) {
    %c0_i32 = arith.constant 0 : i32
    %c0_i32_0 = arith.constant 0 : i32
    %c0_i32_1 = arith.constant 0 : i32
    return %c0_i32, %c0_i32_0 : i32, i32
  }
  func.func @transform_4(%arg0: i32, %arg1: i32) -> (i32, i32) {
    %c0_i32 = arith.constant 0 : i32
    %c0_i32_0 = arith.constant 0 : i32
    %c0_i32_1 = arith.constant 0 : i32
    return %c0_i32, %c0_i32_0 : i32, i32
  }
  func.func @transform_5(%arg0: i32, %arg1: i32) -> (i32, i32) {
    %c0_i32 = arith.constant 0 : i32
    %c0_i32_0 = arith.constant 0 : i32
    %c0_i32_1 = arith.constant 0 : i32
    return %c0_i32, %c0_i32_0 : i32, i32
  }
  func.func @transform_6(%arg0: i32, %arg1: i32) -> (i32, i32) {
    %c0_i32 = arith.constant 0 : i32
    %c0_i32_0 = arith.constant 0 : i32
    %c0_i32_1 = arith.constant 0 : i32
    return %c0_i32, %c0_i32_0 : i32, i32
  }
  func.func @transform_7(%arg0: i32, %arg1: i32) -> (i32, i32) {
    %c0_i32 = arith.constant 0 : i32
    %c0_i32_0 = arith.constant 0 : i32
    %c0_i32_1 = arith.constant 0 : i32
    return %c0_i32, %c0_i32_0 : i32, i32
  }
  func.func @transform_8(%arg0: i32, %arg1: i32) -> (i32, i32) {
    %c0_i32 = arith.constant 0 : i32
    %c0_i32_0 = arith.constant 0 : i32
    %c0_i32_1 = arith.constant 0 : i32
    return %c0_i32, %c0_i32_0 : i32, i32
  }
  func.func @transform_9(%arg0: i32, %arg1: i32) -> (i32, i32) {
    %c0_i32 = arith.constant 0 : i32
    %c0_i32_0 = arith.constant 0 : i32
    %c0_i32_1 = arith.constant 0 : i32
    return %c0_i32, %c0_i32_0 : i32, i32
  }
  func.func @transform_10(%arg0: i32, %arg1: i32) -> (i32, i32) {
    %c0_i32 = arith.constant 0 : i32
    %c0_i32_0 = arith.constant 0 : i32
    %c0_i32_1 = arith.constant 0 : i32
    return %c0_i32, %c0_i32_0 : i32, i32
  }
  func.func @transform_11(%arg0: i32, %arg1: i32) -> (i32, i32) {
    %c0_i32 = arith.constant 0 : i32
    %c0_i32_0 = arith.constant 0 : i32
    %c0_i32_1 = arith.constant 0 : i32
    return %c0_i32, %c0_i32_0 : i32, i32
  }
  func.func @transform_12(%arg0: i32, %arg1: i32) -> (i32, i32) {
    %c0_i32 = arith.constant 0 : i32
    %c0_i32_0 = arith.constant 0 : i32
    %c0_i32_1 = arith.constant 0 : i32
    return %c0_i32, %c0_i32_0 : i32, i32
  }
  func.func @transform_13(%arg0: i32, %arg1: i32) -> (i32, i32, i32) {
    %c0_i32 = arith.constant 0 : i32
    %c0_i32_0 = arith.constant 0 : i32
    return %arg0, %arg1, %c0_i32 : i32, i32, i32
  }
}

</mosaic_0001>

<bundles_post_ra>
// kernel: tpu_custom_call.1
= control target key start
LH: loop header
LB: loop body
LE: loop exit
PB: predicated region body
PF: predicated region fallthrough
CT: control target
= control target key end

     0   :  { %s2563_s0 = inlined_call_operand.vmem [shape: f32[2,8,32], index: 0, kind: input, shape index: {}]   ;;  %s2564_s1 = inlined_call_operand.vmem [shape: f32[1,32], index: 1, kind: input, shape index: {}]   ;;  %s2565_s2 = inlined_call_operand.vmem [shape: bf16[64,32], index: 2, kind: input, shape index: {}]   ;;  %s2566_s3 = inlined_call_operand.vmem [shape: bf16[64,32], index: 3, kind: input, shape index: {}]   ;;  %s2567_s4 = inlined_call_operand.vmem [shape: f32[4,64], index: 4, kind: input, shape index: {}]   ;;  %s2568_s5 = inlined_call_operand.vmem [shape: f32[1,64], index: 5, kind: input, shape index: {}]   ;;  %s2569_s6 = inlined_call_operand.vmem [shape: bf16[2,64], index: 6, kind: input, shape index: {}]   ;;  %s2570_s7 = inlined_call_operand.vmem [shape: bf16[32,64], index: 7, kind: input, shape index: {}]   ;;  %s2571_s8 = inlined_call_operand.vmem [shape: f32[64,2], index: 8, kind: input, shape index: {}]   ;;  %s2572_s9 = inlined_call_operand.vmem [shape: f32[1,64], index: 9, kind: input, shape index: {}]   ;;  %s2573_s10 = inlined_call_operand.vmem [shape: f32[16,64], index: 10, kind: input, shape index: {}]   ;;  %s2574_s11 = inlined_call_operand.vmem [shape: f32[1,64], index: 11, kind: input, shape index: {}]   ;;  %s2575_s12 = inlined_call_operand.vmem [shape: bf16[32,64], index: 12, kind: input, shape index: {}]   ;;  %s2576_s13 = inlined_call_operand.hbm [shape: f32[2,8,32], index: 13, kind: output, shape index: {}]  }
   0x1   :  { %2578 = sst [smem:[#allocation12_spill]] %s2563_s0 }
   0x2   :  { %2579 = sst [smem:[#allocation13_spill]] %s2564_s1 }
   0x3   :  { %18 = vsyncpa [#allocation9], 0 }
   0x4   :  { %20 = vsyncpa [#allocation9 + $0x1], 0  ;;  %s2114_s25 = smov 0   ;;  %s2116_s26 = smov 0  }
   0x5   :  { %s2118_s27 = smov 0   ;;  %s2120_s28 = smov 0  }
   0x6   :  { %s2122_s29 = smov 0   ;;  %s2124_s30 = smov 0  }
   0x7 LB: > { %s1686_s14 = sadd.s32 4294967295, %s2037_s30   ;;  %s1687_s15 = sadd.s32 4294967294, %s2037_s30   ;;  %s2037_s30 = sphi %s2124_s30, %s26_s30   ;;  %s2033_s29 = sphi %s2122_s29, %s2592_s29   ;;  %s2029_s28 = sphi %s2120_s28, %s2591_s28   ;;  %s2025_s27 = sphi %s2118_s27, %s2590_s27   ;;  %s2021_s26 = sphi %s2116_s26, %s2589_s26   ;;  %s2017_s25 = sphi %s2114_s25, %s2588_s25  }
   0x8   : > { %s38_s16 = sadd.s32 1, %s2033_s29  ;;  %s327_s17 = sadd.s32 1, %s2025_s27 }
   0x9   : > { %p40_p0 = scmp.ge.s32.totalorder %s38_s16, 2  ;;  %p337_p1 = scmp.ne.s32.totalorder %s2025_s27, %s2021_s26 }
   0xa   : > { %p338_p2 = scmp.eq.s32.totalorder %s1686_s14, 1  ;;  %p343_p3 = scmp.ne.s32.totalorder %s2021_s26, %s2017_s25 }
   0xb   : > { %s2594_s16 = smov (%p40_p0, %s38_s16), 0  ;;  %p344_p5 = scmp.eq.s32.totalorder %s1687_s15, 1 }
   0xc   : > { %2580 = sst [smem:[#allocation11_spill]] %s2594_s16  ;;  %p2154_p4 = por %p338_p2, %p337_p1 }
   0xd   : > { %s322_s19 = ssub.s32 %s2033_s29, %s2594_s16  ;;  %p1690_p6 = scmp.ge.s32.totalorder %s2037_s30, 1 }
   0xe   : > { %p325_p7 = scmp.eq.s32.totalorder %s322_s19, 0  ;;  %p2161_p8 = por %p344_p5, %p343_p3 }
   0xf   : > { %p408_p9 = scmp.lt.s32.totalorder %s2037_s30, 3 }
  0x10   : > { %s2167_s21 = scalar_select %p325_p7, %s2025_s27, %s327_s17  }
  0x11   : > { %p409_p10 = pnand %p1690_p6, %p408_p9 }
  0x12   : > { %p454_p11 = scmp.lt.s32.totalorder (!%p409_p10), %s2029_s28, 1  ;;  %vm473_vm0 = vcmask (!%p409_p10), 261120   ;;  %v1894_v0 = vld [vmem:[%s2565_s2] sm:$0xff] (!%p409_p10)   ;;  %v2039_v1 = vmov (!%p409_p10), 0.0   ;;  %v1895_v3 = vld [vmem:[%s2565_s2 + $0x8] sm:$0xff] (!%p409_p10)   ;;  %s2583_s0 = sld [smem:[#allocation12_spill]] (!%p409_p10)  ;;  %v590_v30 = vlaneseq (!%p409_p10) }
  0x13   : > { %412 = sbr.rel (%p409_p10) target bundleno = 1237 (0x4d5), region = 72  ;;  %1754 = vmatprep.subr.bf16.mxu0 (!%p409_p10), %v2039_v1  ;;  %1766 = vmatprep.subr.bf16.mxu1 (!%p409_p10), %v2039_v1  ;;  %v523_v2 = vsel (!%p409_p10), %vm473_vm0, %v1894_v0, 0  ;;  %v526_v5 = vsel (!%p409_p10), %vm473_vm0, %v1895_v3, 0  ;;  %v1896_v8 = vld [vmem:[%s2565_s2 + $0x10] sm:$0xff] (!%p409_p10)   ;;  %vm2040_vm1 = vmmov (!%p409_p10), 0   ;;  %v1897_v10 = vld [vmem:[%s2565_s2 + $0x18] sm:$0xff] (!%p409_p10)  }
  0x14   : > { %1755 = vmatpush3.bf16.xpose.msra.mxu0 (!%p409_p10), %v523_v2  ;;  %v529_v9 = vsel (!%p409_p10), %vm473_vm0, %v1896_v8, 0  ;;  %1762 = vmatprep.mubr.msk.bf16.mxu0 (!%p409_p10), %vm2040_vm1, %v2039_v1  ;;  %v532_v11 = vsel (!%p409_p10), %vm473_vm0, %v1897_v10, 0  ;;  %vm470_vm2 = vcmask (!%p409_p10), 518144   ;;  %s2584_s1 = sld [smem:[#allocation13_spill]] (!%p409_p10)  ;;  %v1898_v18 = vld [vmem:[%s2566_s3] sm:$0xff] (!%p409_p10)   ;;  %v1899_v22 = vld [vmem:[%s2566_s3 + $0x8] sm:$0xff] (!%p409_p10)  }
  0x15   : > { %1756 = vmatprep.subr.bf16.mxu0 (!%p409_p10), %v2039_v1  ;;  %1768 = vmatprep.mubr.msk.bf16.mxu1 (!%p409_p10), %vm2040_vm1, %v2039_v1  ;;  %471 = vst.msk [vmem:[#allocation7] sm:$0x7] (!%p409_p10), %vm470_vm2, %v2039_v1  ;;  %v1475_v21 = vsel (!%p409_p10), %vm473_vm0, %v1898_v18, 0  ;;  %v1478_v23 = vsel (!%p409_p10), %vm473_vm0, %v1899_v22, 0  ;;  %v1900_v24 = vld [vmem:[%s2566_s3 + $0x10] sm:$0xff] (!%p409_p10)   ;;  %v1901_v26 = vld [vmem:[%s2566_s3 + $0x18] sm:$0xff] (!%p409_p10)  }
  0x16   : > { %v1481_v25 = vsel (!%p409_p10), %vm473_vm0, %v1900_v24, 0  ;;  %v1484_v27 = vsel (!%p409_p10), %vm473_vm0, %v1901_v26, 0  ;;  %vm467_vm3 = vcmask (!%p409_p10), 523264   ;;  %v646_v28 = vld [vmem:[%s2569_s6] sm:$0x1] (!%p409_p10)  ;;  %v2240_v31 = vshrl.u32 (!%p409_p10), %v590_v30, 7 }
  0x17   : > { %v652_v29 = vsel (!%p409_p10), %vm467_vm3, %v646_v28, 0  ;;  %468 = vst.msk [vmem:[#allocation6] sm:$0xff] (!%p409_p10), %vm467_vm3, %v2039_v1  ;;  %469 = vst.msk [vmem:[#allocation6 + $0x8] sm:$0xff] (!%p409_p10), %vm467_vm3, %v2039_v1  ;;  %v582_v35 = vld [vmem:[%s2567_s4] sm:$0xf] (!%p409_p10)  ;;  %vm575_vm4 = vcmask (!%p409_p10), 523269  }
  0x18   : > { %1767 = vmatpush3.bf16.xpose.msra.mxu1 (!%p409_p10), %v652_v29  ;;  %v598_v32 = vsub.s32 (!%p409_p10), 1, %v2240_v31  ;;  %v612_v33 = vsub.s32 (!%p409_p10), 2, %v2240_v31  ;;  %v626_v34 = vsub.s32 (!%p409_p10), 3, %v2240_v31  ;;  %v2249_v36 = vsub.s32 (!%p409_p10), 0, %v2240_v31  ;;  %v1699_v47 = vld [vmem:[%s2568_s5] ss:$0 sm:$0xff] (!%p409_p10) }
  0x19   : > { %1772 = vmatprep.subr.bf16.mxu1 (!%p409_p10), %v2039_v1  ;;  %vm580_vm5 = vcmask (!%p409_p10), 1042432   ;;  %vm604_vm6 = vcmask (!%p409_p10), 1046528   ;;  %vm618_vm7 = vcmask (!%p409_p10), 1045504   ;;  %vm632_vm8 = vcmask (!%p409_p10), 1044480   ;;  %v754_v24 = vld [vmem:[%s2571_s8] sm:$0xff] (!%p409_p10)  ;;  %v756_v28 = vld [vmem:[%s2571_s8 + $0x10] sm:$0xff] (!%p409_p10) }
  0x1a   : > { %s455_s24 = scalar_select %p454_p11, %s2029_s28, 1  ;;  %v1693_v16 = vld [vmem:[%s2584_s1] ss:$0 sm:$0xff]  ;;  %v599_v38 = vrot.slane %v582_v35, %v598_v32  ;;  %v613_v39 = vrot.slane %v582_v35, %v612_v33  ;;  %v627_v40 = vrot.slane %v582_v35, %v626_v34  ;;  %v593_v42 = vrot.slane %v582_v35, %v2249_v36  ;;  %v757_v29 = vld [vmem:[%s2571_s8 + $0x18] sm:$0xff] }
  0x1b   : > { %vm769_vm9 = vcmask 15360   ;;  %v1824_v30 = vpack.c.bf16 %v757_v29, %v756_v28  ;;  %v758_v35 = vld [vmem:[%s2571_s8 + $0x20] sm:$0xff]  ;;  %vm1429_vm11 = vcmask 1041409   ;;  %vm1431_vm12 = vcmask 1042434   ;;  %s451_s23 = sand.u32 1, %s2021_s26   ;;  %s1724_s16 = sshll.u32 %s2029_s28, 7 }
  0x1c   : > { %s1692_s17 = sshll.u32 %s455_s24, 3  ;;  %1757 = vmatpush3.bf16.xpose.msra.mxu0 %v526_v5  ;;  %v574_v37 = vld [vmem:[#allocation7] sm:$0x7]  ;;  %vm2292_vm10 = vmpackc.low %vm769_vm9, %vm769_vm9  ;;  %vm1433_vm13 = vcmask 1043459   ;;  %vm1435_vm14 = vcmask 1044484   ;;  %vm1437_vm15 = vcmask 1045509   ;;  %s2515_s19 = scalar_lea.hbm %s2576_s13, %s1724_s16 }
  0x1d   : > { %s2184_s22 = scalar_lea.vmem %s2583_s0, %s1692_s17  ;;  %1758 = vmatprep.subr.bf16.mxu0 %v2039_v1  ;;  %vm1441_vm2 = vcmask 1047559   ;;  %s1691_s24 = sshll.u32 %s451_s23, 3 }
  0x1e   : > { %v462_v4 = vld [vmem:[%s2184_s22] sm:$0xff]  ;;  %s453_s14 = scalar_lea.vmem [#allocation8], %s1691_s24  ;;  %s1601_s28 = scalar_lea.sflag [#allocation9], %s451_s23 }
  0x1f   : > { %v472_v6 = vmul.f32 %v462_v4, %v462_v4  ;;  %s1615_s15 = sshll.u32 %s453_s14, 4  ;;  %s2517_s15 = int_to_ptr.vmem [resolvable:$true] %s1615_s15 }
  0x20   : > { %s1959_s24 = scalar_lea.vmem %s2517_s15, 128 }
  0x21   : > { %v474_v7 = vsel %vm473_vm0, %v472_v6, 0.0  ;;  %p1960_p12 = scmp.ne.s32.totalorder %s2517_s15, %s1959_s24 }
  0x22   : > { %475 = vadd.xlane.f32.xlu0 %v474_v7 }
  0x23   : > { %p1961_p13 = pnand %p1960_p12, %p2154_p4 }
  0x24   : > { %1759 = vmatpush3.bf16.xpose.msra.mxu0 %v529_v9 }
  0x25   : > { %1760 = vmatprep.subr.bf16.mxu0 %v2039_v1  ;;  %p1962_p0 = pneg %p1961_p13 }
  0x2c   : > { %1761 = vmatpush3.bf16.xpose.msra.mxu0 %v532_v11 }
  0x2d   : > { %1799 = vmatprep.subr.bf16.mxu0 %v2039_v1 }
  0xaf   : > { %v476_v12 = vpop.xlane.xlu0 %475 }
  0xb0   : > { %v478_v13 = vmul.f32 0.03125, %v476_v12 }
  0xb2   : > { %v479_v14 = vadd.f32 1e-05, %v478_v13 }
  0xb4   : > { %1908 = vrsqrt.f32 %v479_v14  ;;  %v1902_v14 = vld [vmem:[%s2570_s7] sm:$0xff]  }
  0xbe   : > { %v1909_v15 = vpop.eup %1908 }
  0xbf   : > { %v481_v17 = vmul.f32 %v1909_v15, %v462_v4 }
  0xc1   : > { %v489_v19 = vmul.f32 %v1693_v16, %v481_v17  ;;  %v1714_v16 = vld [vmem:[%s2574_s11] ss:$0 sm:$0xff] }
  0xc3   : > { %v490_v20 = vpack.c.bf16 %v489_v19, %v489_v19 }
  0xc5   : > { %1763 = vmatmul.mubr.msk.bf16.vlgmr.msra.gmra.mrb[0].mxu0 %vm473_vm0, %v490_v20 }
  0xc6   : > { %1800 = vmatpush3.bf16.xpose.msra.mxu0 %v1475_v21  ;;  %1807 = vmatprep.mubr.msk.bf16.mxu0 %vm2040_vm1, %v2039_v1  ;;  %v1903_v21 = vld [vmem:[%s2570_s7 + $0x8] sm:$0xff]  }
  0xc7   : > { %1801 = vmatprep.subr.bf16.mxu0 %v2039_v1  ;;  %v712_v22 = vsel %vm467_vm3, %v1903_v21, 0 }
  0xce   : > { %1802 = vmatpush3.bf16.xpose.msra.mxu0 %v1478_v23  ;;  %v2041_v23 = vmov 0.0|0.0  }
  0xcf   : > { %1803 = vmatprep.subr.bf16.mxu0 %v2039_v1 }
  0xd6   : > { %1804 = vmatpush3.bf16.xpose.msra.mxu0 %v1481_v25  ;;  %v755_v25 = vld [vmem:[%s2571_s8 + $0x8] sm:$0xff] }
  0xd7   : > { %1805 = vmatprep.subr.bf16.mxu0 %v2039_v1  ;;  %v1820_v26 = vpack.c.bf16 %v755_v25, %v754_v24 }
  0xde   : > { %1806 = vmatpush3.bf16.xpose.msra.mxu0 %v1484_v27 }
  0xe5   : > { %1808 = vmatmul.mubr.msk.bf16.vlgmr.msra.gmra.mrb[4].mxu0 %vm473_vm0, %v490_v20  ;;  %v709_v20 = vsel %vm467_vm3, %v1902_v14, 0 }
 0x198   : > { %v568_v41 = vpop.f32.mrb[0].mxu0 }
 0x199   : > { %576 = vst.msk [vmem:[#allocation7 - $0x5] sm:$0xe0] %vm575_vm4, %v568_v41  ;;  %v578_v43 = vrot.slane %v568_v41, 5  ;;  %v1764_v44 = vpop.f32.mrb[1].mxu0 }
 0x19a   : > { %v571_v45 = vpop.f32.mrb[2].mxu0 }
 0x19b   : > { %v581_v46 = vsel %vm580_vm5, %v574_v37, %v578_v43  ;;  %v601_v48 = vmul.f32 %v599_v38, %v578_v43  ;;  %v615_v49 = vmul.f32 %v613_v39, %v578_v43  ;;  %v629_v50 = vmul.f32 %v627_v40, %v578_v43  ;;  %v1765_v51 = vpop.f32.mrb[3].mxu0  ;;  %v759_v37 = vld [vmem:[%s2571_s8 + $0x28] sm:$0xff] }
 0x19c   : > { %v594_v52 = vmul.f32 %v593_v42, %v581_v46  ;;  %v600_v53 = vmul.f32 %v599_v38, %v581_v46  ;;  %v614_v54 = vmul.f32 %v613_v39, %v581_v46  ;;  %v628_v55 = vmul.f32 %v627_v40, %v581_v46  ;;  %v760_v39 = vld [vmem:[%s2571_s8 + $0x30] sm:$0xff]  ;;  %v761_v40 = vld [vmem:[%s2571_s8 + $0x38] sm:$0xff] }
 0x19d   : > { %v606_v56 = vrot.slane %v601_v48, 1  ;;  %v620_v60 = vrot.slane %v615_v49, 2  ;;  %v634_v63 = vrot.slane %v629_v50, 3  ;;  %v1828_v38 = vpack.c.bf16 %v759_v37, %v758_v35 }
 0x19e   : > { %v595_v57 = vadd.f32 %v1699_v47, %v594_v52  ;;  %v605_v58 = vrot.slane %v600_v53, 1  ;;  %v619_v59 = vrot.slane %v614_v54, 2  ;;  %v633_v62 = vrot.slane %v628_v55, 3 }
 0x19f   : > { %v1832_v41 = vpack.c.bf16 %v761_v40, %v760_v39  ;;  %v1084_v52 = vsub.s32 4, %v2240_v31  ;;  %v1095_v55 = vsub.s32 5, %v2240_v31 }
 0x1a0   : > { %v607_v61 = vsel %vm604_vm6, %v605_v58, %v606_v56  ;;  %v621_v2 = vsel %vm618_vm7, %v619_v59, %v620_v60  ;;  %v635_v4 = vsel %vm632_vm8, %v633_v62, %v634_v63  ;;  %v1117_v60 = vsub.s32 7, %v2240_v31  ;;  %v1907_v62 = vld [vmem:[%s2575_s12 + $0x8] sm:$0xff]  }
 0x1a1   : > { %v609_v0 = vadd.f32 %v607_v61, %v595_v57  ;;  %v1106_v57 = vsub.s32 6, %v2240_v31  ;;  %v1557_v63 = vsel %vm467_vm3, %v1907_v62, 0 }
 0x1a3   : > { %v623_v3 = vadd.f32 %v621_v2, %v609_v0  ;;  %v1704_v2 = vld [vmem:[%s2572_s9] ss:$0 sm:$0xff] }
 0x1a5   : > { %v637_v5 = vadd.f32 %v635_v4, %v623_v3 }
 0x1a7   : > { %v638_v6 = vsub.f32 0.0, %v637_v5 }
 0x1a9   : > { %v639_v7 = vmul.f32 1.442695, %v638_v6 }
 0x1ab   : > { %1910 = vpow2.f32 %v639_v7 }
 0x1b5   : > { %v1911_v8 = vpop.eup %1910 }
 0x1b6   : > { %v641_v9 = vadd.f32 1.0, %v1911_v8 }
 0x1b8   : > { %v2261_v10 = vpop.f32.mrb[4].mxu0  ;;  %1912 = vrcp.f32 %v641_v9 }
 0x1b9   : > { %v1809_v11 = vpop.f32.mrb[5].mxu0 }
 0x1ba   : > { %v1523_v12 = vpop.f32.mrb[6].mxu0 }
 0x1bb   : > { %v1810_v13 = vpop.f32.mrb[7].mxu0 }
 0x1c2   : > { %v1913_v15 = vpop.eup %1912 }
 0x1c3   : > { %v2269_v17 = vmul.f32 %v1913_v15, %v637_v5 }
 0x1c5   : > { %v645_v18 = vpack.c.bf16 %v2269_v17, %v2269_v17  ;;  %v887_v19 = vmul.f32 %v1714_v16, %v2269_v17  ;;  %v889_v16 = vld [vmem:[%s2573_s10] sm:$0xff] }
 0x1c6   : > { %v891_v21 = vmul.f32 1.442695, %v889_v16 }
 0x1c7   : > { %1769 = vmatmul.mubr.msk.bf16.vlgmr.msra.gmra.mrb[0].mxu1 %vm467_vm3, %v645_v18  ;;  %888 = vst.msk [vmem:[#allocation5] sm:$0xff] %vm467_vm3, %v887_v19 }
 0x1c8   : > { %1773 = vmatpush3.bf16.xpose.msra.mxu1 %v709_v20  ;;  %1776 = vmatprep.mubr.msk.bf16.mxu1 %vm2040_vm1, %v2039_v1 }
 0x1c9   : > { %1774 = vmatprep.subr.bf16.mxu1 %v2039_v1 }
 0x1d0   : > { %1775 = vmatpush3.bf16.xpose.msra.mxu1 %v712_v22  ;;  %v2042_v22 = vmov 1966171168  }
 0x1d1   : > { %1819 = vmatprep.subr.bf16.mxu1 %v2041_v23 }
 0x1d7   : > { %1777 = vmatmul.mubr.msk.bf16.vlgmr.msra.gmra.mrb[4].mxu1 %vm467_vm3, %v645_v18  ;;  %v890_v18 = vld [vmem:[%s2573_s10 + $0x8] sm:$0xff] }
 0x1d8   : > { %1822 = vmatpush3.bf16.xpose.msk.msra.mxu1 %vm2292_vm10, %v1820_v26  ;;  %1796 = vmatprep.mubr.msk.f32.mxu1 %vm2040_vm1, %v2039_v1  ;;  %v893_v27 = vmul.f32 1.442695, %v890_v18 }
 0x1d9   : > { %1823 = vmatprep.subr.bf16.mxu1 %v2041_v23 }
 0x1e0   : > { %1826 = vmatpush3.bf16.xpose.msk.msra.mxu1 %vm2292_vm10, %v1824_v30 }
 0x1e1   : > { %1827 = vmatprep.subr.bf16.mxu1 %v2041_v23 }
 0x1e8   : > { %1830 = vmatpush3.bf16.xpose.msk.msra.mxu1 %vm2292_vm10, %v1828_v38 }
 0x1e9   : > { %1831 = vmatprep.subr.bf16.mxu1 %v2041_v23  ;;  %v903_v23 = vunpack.c.l.s4 %v2042_v22 }
 0x1eb   : > { %v904_v29 = vunpack.c.0.s8 %v903_v23 }
 0x1ed   : > { %v2383_v38 = vsub.s32 %v904_v29, %v2240_v31 }
 0x1f0   : > { %1834 = vmatpush3.bf16.xpose.msk.msra.mxu1 %vm2292_vm10, %v1832_v41 }
 0x1f1   : > { %1811 = vmatprep.subr.bf16.mxu1 %v2039_v1 }
 0x29a   : > { %v688_v42 = vpop.f32.mrb[0].mxu1 }
 0x29b   : > { %v1770_v43 = vpop.f32.mrb[1].mxu1  ;;  %1797 = vmatmul.mubr.msk.f32.vlgmr.msra.gmra.mrb[8].mxu1 %vm769_vm9, %v688_v42 }
 0x29c   : > { %v691_v44 = vpop.f32.mrb[2].mxu1  ;;  %1815 = vmatprep.mubr.msk.bf16.mxu1 %vm2040_vm1, %v2039_v1  ;;  %vm1439_vm1 = vcmask 1046534  }
 0x29d   : > { %v1771_v45 = vpop.f32.mrb[3].mxu1 }
 0x2aa   : > { %v748_v46 = vpop.f32.mrb[4].mxu1 }
 0x2ab   : > { %879 = vst.msk [vmem:[#allocation4] sm:$0xff] %vm473_vm0, %v748_v46  ;;  %v1778_v47 = vpop.f32.mrb[5].mxu1 }
 0x2ac   : > { %v751_v48 = vpop.f32.mrb[6].mxu1 }
 0x2ad   : > { %v1779_v49 = vpop.f32.mrb[7].mxu1 }
 0x2b2   : > { %v897_v50 = vld [vmem:[#allocation4] sm:$0xff] }
 0x2b3   : > { %v1041_v51 = vrot.slane %v897_v50, %v2249_v36  ;;  %v1052_v53 = vrot.slane %v897_v50, %v598_v32  ;;  %v1085_v54 = vrot.slane %v897_v50, %v1084_v52  ;;  %v1096_v56 = vrot.slane %v897_v50, %v1095_v55 }
 0x2b4   : > { %v1063_v58 = vrot.slane %v897_v50, %v612_v33  ;;  %v1107_v59 = vrot.slane %v897_v50, %v1106_v57  ;;  %v1074_v32 = vrot.slane %v897_v50, %v626_v34  ;;  %v1118_v61 = vrot.slane %v897_v50, %v1117_v60  ;;  %v1906_v33 = vld [vmem:[%s2575_s12] sm:$0xff]  }
 0x2b5   : > { %1047 = vbcast.lane.b32.xlu1 %v1041_v51, 264  ;;  %1043 = vbcast.lane.b32.xlu0 %v1041_v51, 256  ;;  %v1554_v34 = vsel %vm467_vm3, %v1906_v33, 0 }
 0x2b6   : > { %1812 = vmatpush3.bf16.xpose.msra.mxu1 %v1554_v34 }
 0x2b7   : > { %1813 = vmatprep.subr.bf16.mxu1 %v2039_v1 }
 0x2b9   : > { %1054 = vbcast.lane.b32.xlu1 %v1052_v53, 256  ;;  %1087 = vbcast.lane.b32.xlu0 %v1085_v54, 256 }
 0x2bd   : > { %1058 = vbcast.lane.b32.xlu1 %v1052_v53, 264  ;;  %1098 = vbcast.lane.b32.xlu0 %v1096_v56, 256 }
 0x2be   : > { %1814 = vmatpush3.bf16.xpose.msra.mxu1 %v1557_v63 }
 0x2c1   : > { %1065 = vbcast.lane.b32.xlu1 %v1063_v58, 256  ;;  %1109 = vbcast.lane.b32.xlu0 %v1107_v59, 256 }
 0x2c5   : > { %1069 = vbcast.lane.b32.xlu1 %v1063_v58, 264  ;;  %1270 = vbcast.lane.b32.xlu0 %v1041_v51, 272 }
 0x2c9   : > { %1076 = vbcast.lane.b32.xlu1 %v1074_v32, 256  ;;  %1278 = vbcast.lane.b32.xlu0 %v1052_v53, 272 }
 0x2cd   : > { %1080 = vbcast.lane.b32.xlu1 %v1074_v32, 264  ;;  %1286 = vbcast.lane.b32.xlu0 %v1063_v58, 272 }
 0x2d1   : > { %1091 = vbcast.lane.b32.xlu1 %v1085_v54, 264  ;;  %1120 = vbcast.lane.b32.xlu0 %v1118_v61, 256 }
 0x2d5   : > { %1102 = vbcast.lane.b32.xlu1 %v1096_v56, 264  ;;  %1294 = vbcast.lane.b32.xlu0 %v1074_v32, 272 }
 0x2d9   : > { %1113 = vbcast.lane.b32.xlu1 %v1107_v59, 264  ;;  %1302 = vbcast.lane.b32.xlu0 %v1085_v54, 272 }
 0x2dd   : > { %1274 = vbcast.lane.b32.xlu1 %v1041_v51, 280  ;;  %1310 = vbcast.lane.b32.xlu0 %v1096_v56, 272 }
 0x2e1   : > { %1282 = vbcast.lane.b32.xlu1 %v1052_v53, 280  ;;  %1318 = vbcast.lane.b32.xlu0 %v1107_v59, 272 }
 0x2e5   : > { %1290 = vbcast.lane.b32.xlu1 %v1063_v58, 280  ;;  %1326 = vbcast.lane.b32.xlu0 %v1118_v61, 272 }
 0x2e9   : > { %1124 = vbcast.lane.b32.xlu1 %v1118_v61, 264 }
 0x2ed   : > { %1298 = vbcast.lane.b32.xlu1 %v1074_v32, 280 }
 0x2f1   : > { %1306 = vbcast.lane.b32.xlu1 %v1085_v54, 280 }
 0x2f5   : > { %1314 = vbcast.lane.b32.xlu1 %v1096_v56, 280 }
 0x2f9   : > { %1322 = vbcast.lane.b32.xlu1 %v1107_v59, 280 }
 0x2fd   : > { %1330 = vbcast.lane.b32.xlu1 %v1118_v61, 280 }
 0x327   : > { %v2350_v0 = vpop.permute.xlu1 %1047  ;;  %v2371_v20 = vpop.permute.xlu0 %1043 }
 0x32b   : > { %v2355_v6 = vpop.permute.xlu1 %1054  ;;  %v2377_v35 = vpop.permute.xlu0 %1087 }
 0x32f   : > { %v2357_v9 = vpop.permute.xlu1 %1058  ;;  %v2385_v39 = vpop.permute.xlu0 %1098 }
 0x333   : > { %v2359_v11 = vpop.permute.xlu1 %1065  ;;  %v2393_v48 = vpop.permute.xlu0 %1109 }
 0x337   : > { %v2361_v14 = vpop.permute.xlu1 %1069  ;;  %v2405_v58 = vpop.permute.xlu0 %1270 }
 0x33b   : > { %v2363_v15 = vpop.permute.xlu1 %1076 }
 0x33f   : > { %v2373_v24 = vpop.permute.xlu1 %1080 }
 0x343   : > { %v2379_v37 = vpop.permute.xlu1 %1091 }
 0x347   : > { %v2387_v41 = vpop.permute.xlu1 %1102 }
 0x34b   : > { %v2399_v51 = vpop.permute.xlu1 %1113 }
 0x34f   : > { %v2407_v59 = vpop.permute.xlu1 %1274 }
 0x353   : > { %v2420_v16 = vpop.permute.xlu1 %1282 }
 0x36e   : > { %v863_v3 = vpop.f32.mrb[8].mxu1 }
 0x36f   : > { %v864_v4 = vadd.f32 %v1704_v2, %v863_v3  ;;  %v1798_v5 = vpop.f32.mrb[9].mxu1 }
 0x371   : > { %v868_v7 = vand.u32 2147483647, %v864_v4  ;;  %v867_v25 = vmax.f32 %v864_v4, 0.0  ;;  %v1527_v4 = vsub.f32 0.0, %v2261_v10 }
 0x373   : > { %v869_v1 = vsub.f32 0.0, %v868_v7  ;;  %v2416_v7 = vpop.permute.xlu0 %1278 }
 0x375   : > { %v870_v8 = vmul.f32 1.442695, %v869_v1 }
 0x377   : > { %1914 = vpow2.f32 %v870_v8 }
 0x381   : > { %v1915_v12 = vpop.eup %1914 }
 0x382   : > { %v872_v13 = vadd.f32 1.0, %v1915_v12 }
 0x384   : > { %1916 = vlog2.f32 %v872_v13 }
 0x385   : > { %1918 = vpow2.f32 %v891_v21 }
 0x386   : > { %1920 = vpow2.f32 %v893_v27 }
 0x38e   : > { %v1917_v19 = vpop.eup %1916 }
 0x38f   : > { %v874_v26 = vmul.f32 0.6931472, %v1917_v19  ;;  %v1919_v43 = vpop.eup %1918 }
 0x390   : > { %v1921_v44 = vpop.eup %1920  ;;  %v2391_v47 = vsub.f32 0.0, %v1919_v43 }
 0x391   : > { %v875_v28 = vadd.f32 %v874_v26, %v867_v25  ;;  %v2395_v49 = vsub.f32 0.0, %v1921_v44  ;;  %v1528_v25 = vmul.f32 1.442695, %v1527_v4 }
 0x393   : > { %876 = vst.msk [vmem:[#allocation2] sm:$0xff] %vm467_vm3, %v875_v28  ;;  %v877_v30 = vmul.f32 %v875_v28, %v2269_v17 }
 0x395   : > { %878 = vst.msk [vmem:[#allocation3] sm:$0xff] %vm467_vm3, %v877_v30 }
 0x39a   : > { %v898_v40 = vld [vmem:[#allocation2] sm:$0xff] }
 0x39b   : > { %v908_v42 = vrot.slane %v898_v40, %v2383_v38  ;;  %v901_v17 = vcombine.high %v898_v40, %v898_v40 }
 0x39c   : > { %v899_v61 = vld [vmem:[#allocation3] sm:$0xff] }
 0x39d   : > { %v916_v45 = vcombine.high %v908_v42, %v908_v42  ;;  %v924_v46 = vrot.slane %v908_v42, %v2383_v38  ;;  %v915_v52 = vrot.slane %v901_v17, %v2383_v38  ;;  %v1134_v5 = vrot.slane %v899_v61, %v2383_v38  ;;  %v2430_v17 = vpop.permute.xlu0 %1286 }
 0x39e   : > { %v1127_v23 = vcombine.high %v899_v61, %v899_v61 }
 0x39f   : > { %v938_v31 = vrot.slane %v916_v45, %v2383_v38  ;;  %v953_v50 = vrot.slane %v924_v46, %v2249_v36  ;;  %v946_v54 = vcombine.high %v924_v46, %v924_v46  ;;  %v917_v57 = vcombine.high %v915_v52, %v915_v52 }
 0x3a0   : > { %v931_v32 = vrot.slane %v915_v52, %v2383_v38  ;;  %v1142_v27 = vcombine.high %v1134_v5, %v1134_v5  ;;  %v1150_v28 = vrot.slane %v1134_v5, %v2383_v38 }
 0x3a1   : > { %v990_v53 = vmul.f32 %v953_v50, %v2391_v47  ;;  %v957_v55 = vrot.slane %v938_v31, %v2249_v36  ;;  %v991_v56 = vmul.f32 %v953_v50, %v2395_v49  ;;  %v948_v33 = vcombine.high %v938_v31, %v938_v31  ;;  %v2435_v50 = vpop.permute.xlu1 %1290 }
 0x3a2   : > { %v961_v34 = vrot.slane %v946_v54, %v2249_v36  ;;  %v945_v2 = vrot.slane %v917_v57, %v2383_v38  ;;  %v947_v1 = vcombine.high %v931_v32, %v931_v32  ;;  %v969_v22 = vrot.slane %v931_v32, %v2249_v36 }
 0x3a3   : > { %v1006_v60 = vmul.f32 1.442695, %v990_v53  ;;  %v992_v62 = vmul.f32 %v957_v55, %v2391_v47  ;;  %v1008_v63 = vmul.f32 1.442695, %v991_v56  ;;  %v993_v3 = vmul.f32 %v957_v55, %v2395_v49 }
 0x3a4   : > { %v965_v8 = vrot.slane %v948_v33, %v2249_v36  ;;  %v994_v12 = vmul.f32 %v961_v34, %v2391_v47  ;;  %v949_v18 = vcombine.high %v945_v2, %v945_v2  ;;  %v995_v19 = vmul.f32 %v961_v34, %v2395_v49 }
 0x3a5   : > { %1922 = vpow2.f32 %v1006_v60  ;;  %v1010_v13 = vmul.f32 1.442695, %v992_v62  ;;  %v1012_v21 = vmul.f32 1.442695, %v993_v3  ;;  %v973_v26 = vrot.slane %v945_v2, %v2249_v36  ;;  %v1232_v60 = vld [vmem:[#allocation6] sm:$0xff] }
 0x3a6   : > { %1924 = vpow2.f32 %v1008_v63  ;;  %v977_v29 = vrot.slane %v947_v1, %v2249_v36  ;;  %v996_v30 = vmul.f32 %v965_v8, %v2391_v47  ;;  %v1014_v40 = vmul.f32 1.442695, %v994_v12  ;;  %v1233_v63 = vld [vmem:[#allocation6 + $0x8] sm:$0xff] }
 0x3a7   : > { %1926 = vpow2.f32 %v1010_v13  ;;  %v981_v42 = vrot.slane %v949_v18, %v2249_v36  ;;  %v997_v43 = vmul.f32 %v965_v8, %v2395_v49  ;;  %v1016_v44 = vmul.f32 1.442695, %v995_v19  ;;  %v2447_v18 = vpop.permute.xlu0 %1120 }
 0x3a8   : > { %1928 = vpow2.f32 %v1012_v21  ;;  %v998_v45 = vmul.f32 %v969_v22, %v2391_v47  ;;  %v999_v46 = vmul.f32 %v969_v22, %v2395_v49  ;;  %v1141_v31 = vrot.slane %v1127_v23, %v2383_v38  ;;  %v2450_v22 = vpop.permute.xlu1 %1124 }
 0x3a9   : > { %1930 = vpow2.f32 %v1528_v25  ;;  %v1000_v52 = vmul.f32 %v973_v26, %v2391_v47  ;;  %v1164_v53 = vrot.slane %v1142_v27, %v2383_v38  ;;  %v1179_v54 = vrot.slane %v1150_v28, %v2249_v36 }
 0x3aa   : > { %v1001_v56 = vmul.f32 %v973_v26, %v2395_v49  ;;  %v1002_v57 = vmul.f32 %v977_v29, %v2391_v47  ;;  %1932 = vpow2.f32 %v1014_v40  ;;  %v1018_v32 = vmul.f32 1.442695, %v996_v30 }
 0x3ab   : > { %v1003_v33 = vmul.f32 %v977_v29, %v2395_v49  ;;  %v1004_v34 = vmul.f32 %v981_v42, %v2391_v47  ;;  %1934 = vpow2.f32 %v1016_v44  ;;  %v1020_v62 = vmul.f32 1.442695, %v997_v43 }
 0x3ac   : > { %v1005_v2 = vmul.f32 %v981_v42, %v2395_v49  ;;  %v1022_v3 = vmul.f32 1.442695, %v998_v45  ;;  %v1024_v4 = vmul.f32 1.442695, %v999_v46  ;;  %v1143_v5 = vcombine.high %v1141_v31, %v1141_v31 }
 0x3ad   : > { %v1172_v1 = vcombine.high %v1150_v28, %v1150_v28  ;;  %v1183_v8 = vrot.slane %v1164_v53, %v2249_v36  ;;  %v1216_v12 = vmul.f32 %v1179_v54, %v2371_v20  ;;  %1936 = vpow2.f32 %v1018_v32 }
 0x3ae   : > { %v1026_v19 = vmul.f32 1.442695, %v1000_v52  ;;  %v1217_v47 = vmul.f32 %v1179_v54, %v2350_v0  ;;  %1938 = vpow2.f32 %v1020_v62  ;;  %v1028_v49 = vmul.f32 1.442695, %v1001_v56 }
 0x3af   : > { %v1923_v55 = vpop.eup %1922  ;;  %v1157_v23 = vrot.slane %v1141_v31, %v2383_v38  ;;  %v1030_v27 = vmul.f32 1.442695, %v1002_v57  ;;  %v2454_v28 = vrot.slane %v1143_v5, %v2383_v38  ;;  %v1174_v20 = vcombine.high %v1164_v53, %v1164_v53 }
 0x3b0   : > { %v1925_v61 = vpop.eup %1924  ;;  %v1234_v13 = vmul.f32 %v1923_v55, %v1232_v60  ;;  %v1032_v40 = vmul.f32 1.442695, %v1003_v33  ;;  %v1187_v42 = vrot.slane %v1172_v1, %v2249_v36  ;;  %v1218_v0 = vmul.f32 %v1183_v8, %v2355_v6  ;;  %v1295_v55 = vpop.permute.xlu0 %1294 }
 0x3b1   : > { %v1235_v21 = vmul.f32 %v1925_v61, %v1233_v63  ;;  %v1927_v26 = vpop.eup %1926  ;;  %1940 = vpow2.f32 %v1022_v3  ;;  %v1034_v44 = vmul.f32 1.442695, %v1004_v34  ;;  %v1219_v45 = vmul.f32 %v1183_v8, %v2357_v9  ;;  %v1299_v60 = vpop.permute.xlu1 %1298 }
 0x3b2   : > { %v1236_v25 = vadd.f32 %v1234_v13, %v1216_v12  ;;  %v1929_v30 = vpop.eup %1928  ;;  %1942 = vpow2.f32 %v1024_v4  ;;  %v1036_v52 = vmul.f32 1.442695, %v1005_v2  ;;  %v1173_v38 = vcombine.high %v1157_v23, %v1157_v23 }
 0x3b3   : > { %v1237_v29 = vadd.f32 %v1235_v21, %v1217_v47  ;;  %v2459_v31 = vpop.eup %1930  ;;  %1944 = vpow2.f32 %v1026_v19  ;;  %v1175_v56 = vcombine.high %v2454_v28, %v2454_v28  ;;  %v1191_v6 = vrot.slane %v1174_v20, %v2249_v36 }
 0x3b4   : > { %v1238_v43 = vmul.f32 %v1927_v26, %v1236_v25  ;;  %v1933_v53 = vpop.eup %1932  ;;  %v1220_v9 = vmul.f32 %v1187_v42, %v2359_v11  ;;  %v1221_v61 = vmul.f32 %v1187_v42, %v2361_v14  ;;  %v1332_v63 = vmul.f32 %v2405_v58, %v1236_v25  ;;  %v1303_v19 = vpop.permute.xlu0 %1302 }
 0x3b5   : > { %v1239_v46 = vmul.f32 %v1929_v30, %v1237_v29  ;;  %v1935_v32 = vpop.eup %1934  ;;  %v1333_v2 = vmul.f32 %v2407_v59, %v1237_v29  ;;  %1946 = vpow2.f32 %v1028_v49  ;;  %v1195_v4 = vrot.slane %v1157_v23, %v2249_v36 }
 0x3b6   : > { %v1240_v54 = vadd.f32 %v1238_v43, %v1218_v0  ;;  %v1199_v5 = vrot.slane %v2454_v28, %v2249_v36  ;;  %1948 = vpow2.f32 %v1030_v27  ;;  %v1222_v14 = vmul.f32 %v1191_v6, %v2363_v15  ;;  %v1307_v15 = vpop.permute.xlu1 %1306 }
 0x3b7   : > { %v1241_v57 = vadd.f32 %v1239_v46, %v1219_v45  ;;  %v1937_v11 = vpop.eup %1936  ;;  %v1348_v49 = vsel %vm467_vm3, %v1332_v63, 0.0  ;;  %v1349_v23 = vsel %vm467_vm3, %v1333_v2, 0.0  ;;  %1950 = vpow2.f32 %v1032_v40 }
 0x3b8   : > { %v1242_v33 = vmul.f32 %v1933_v53, %v1240_v54  ;;  %v1334_v34 = vmul.f32 %v2416_v7, %v1240_v54  ;;  %v1223_v7 = vmul.f32 %v1191_v6, %v2373_v24  ;;  %v1939_v12 = vpop.eup %1938  ;;  %v1203_v24 = vrot.slane %v1173_v38, %v2249_v36  ;;  %v1311_v6 = vpop.permute.xlu0 %1310 }
 0x3b9   : > { %v1243_v62 = vmul.f32 %v1935_v32, %v1241_v57  ;;  %v1335_v3 = vmul.f32 %v2420_v16, %v1241_v57  ;;  %v1224_v27 = vmul.f32 %v1195_v4, %v2377_v35  ;;  %v1350_v43 = vadd.f32 %v1349_v23, %v1348_v49 }
 0x3ba   : > { %v1244_v1 = vadd.f32 %v1242_v33, %v1220_v9  ;;  %v1357_v16 = vsel %vm467_vm3, %v1334_v34, 0.0  ;;  %1952 = vpow2.f32 %v1034_v44  ;;  %v1207_v54 = vrot.slane %v1175_v56, %v2249_v36 }
 0x3bb   : > { %v1245_v8 = vadd.f32 %v1243_v62, %v1221_v61  ;;  %v1358_v13 = vsel %vm467_vm3, %v1335_v3, 0.0  ;;  %1954 = vpow2.f32 %v1036_v52  ;;  %v1226_v57 = vmul.f32 %v1199_v5, %v2385_v39  ;;  %v1315_v61 = vpop.permute.xlu1 %1314 }
 0x3bc   : > { %v1246_v58 = vmul.f32 %v1937_v11, %v1244_v1  ;;  %v1336_v59 = vmul.f32 %v2430_v17, %v1244_v1  ;;  %v1941_v17 = vpop.eup %1940  ;;  %v1359_v20 = vadd.f32 %v1358_v13, %v1357_v16  ;;  %v1227_v44 = vmul.f32 %v1199_v5, %v2387_v41 }
 0x3bd   : > { %v1247_v47 = vmul.f32 %v1939_v12, %v1245_v8  ;;  %v1337_v21 = vmul.f32 %v2435_v50, %v1245_v8  ;;  %v1943_v30 = vpop.eup %1942  ;;  %v1225_v50 = vmul.f32 %v1195_v4, %v2379_v37  ;;  %v1351_v34 = vrot.slane %v1350_v43, 4 }
 0x3be   : > { %v1248_v25 = vadd.f32 %v1246_v58, %v1222_v14  ;;  %v1366_v26 = vsel %vm467_vm3, %v1336_v59, 0.0  ;;  %v1945_v45 = vpop.eup %1944  ;;  %v1360_v9 = vrot.slane %v1359_v20, 4  ;;  %v1228_v2 = vmul.f32 %v1203_v24, %v2393_v48  ;;  %v1319_v59 = vpop.permute.xlu0 %1318 }
 0x3bf   : > { %v1249_v28 = vadd.f32 %v1247_v47, %v1223_v7  ;;  %v1367_v29 = vsel %vm467_vm3, %v1337_v21, 0.0  ;;  %v1229_v39 = vmul.f32 %v1203_v24, %v2399_v51  ;;  %v1230_v7 = vmul.f32 %v1207_v54, %v2447_v18  ;;  %v1323_v51 = vpop.permute.xlu1 %1322 }
 0x3c0   : > { %v1250_v42 = vmul.f32 %v1941_v17, %v1248_v25  ;;  %v1338_v0 = vmul.f32 %v1295_v55, %v1248_v25  ;;  %v1368_v38 = vadd.f32 %v1367_v29, %v1366_v26  ;;  %v1947_v55 = vpop.eup %1946  ;;  %v1361_v11 = vadd.f32 %v1360_v9, %v1359_v20 }
 0x3c1   : > { %v1251_v40 = vmul.f32 %v1943_v30, %v1249_v28  ;;  %v1339_v46 = vmul.f32 %v1299_v60, %v1249_v28  ;;  %v1949_v52 = vpop.eup %1948  ;;  %v1352_v48 = vadd.f32 %v1351_v34, %v1350_v43  ;;  %v1231_v24 = vmul.f32 %v1207_v54, %v2450_v22 }
 0x3c2   : > { %v1252_v53 = vadd.f32 %v1250_v42, %v1224_v27  ;;  %v1375_v35 = vsel %vm467_vm3, %v1338_v0, 0.0  ;;  %v1369_v56 = vrot.slane %v1368_v38, 4  ;;  %v1951_v5 = vpop.eup %1950  ;;  %v1362_v26 = vrot.slane %v1361_v11, 2 }
 0x3c3   : > { %v1253_v32 = vadd.f32 %v1251_v40, %v1225_v50  ;;  %v1376_v37 = vsel %vm467_vm3, %v1339_v46, 0.0  ;;  %v1353_v42 = vrot.slane %v1352_v48, 2 }
 0x3c4   : > { %v1254_v33 = vmul.f32 %v1945_v45, %v1252_v53  ;;  %v1340_v60 = vmul.f32 %v1303_v19, %v1252_v53  ;;  %v1377_v63 = vadd.f32 %v1376_v37, %v1375_v35  ;;  %v1370_v19 = vadd.f32 %v1369_v56, %v1368_v38  ;;  %v1327_v38 = vpop.permute.xlu0 %1326  ;;  %v1331_v35 = vpop.permute.xlu1 %1330 }
 0x3c5   : > { %v1255_v62 = vmul.f32 %v1947_v55, %v1253_v32  ;;  %v1341_v36 = vmul.f32 %v1307_v15, %v1253_v32  ;;  %v1953_v15 = vpop.eup %1952  ;;  %v1354_v55 = vadd.f32 %v1353_v42, %v1352_v48 }
 0x3c6   : > { %v1256_v3 = vadd.f32 %v1254_v33, %v1226_v57  ;;  %v1384_v4 = vsel %vm467_vm3, %v1340_v60, 0.0  ;;  %v1378_v14 = vrot.slane %v1377_v63, 4  ;;  %v1955_v17 = vpop.eup %1954  ;;  %v1371_v0 = vrot.slane %v1370_v19, 2 }
 0x3c7   : > { %v1257_v1 = vadd.f32 %v1255_v62, %v1227_v44  ;;  %v1385_v41 = vsel %vm467_vm3, %v1341_v36, 0.0  ;;  %v1363_v57 = vadd.f32 %v1362_v26, %v1361_v11 }
 0x3c8   : > { %v1258_v8 = vmul.f32 %v1949_v52, %v1256_v3  ;;  %v1342_v12 = vmul.f32 %v1311_v6, %v1256_v3  ;;  %v1386_v58 = vadd.f32 %v1385_v41, %v1384_v4  ;;  %v1379_v21 = vadd.f32 %v1378_v14, %v1377_v63 }
 0x3c9   : > { %v1259_v16 = vmul.f32 %v1951_v5, %v1257_v1  ;;  %v1343_v13 = vmul.f32 %v1315_v61, %v1257_v1  ;;  %v1372_v61 = vadd.f32 %v1371_v0, %v1370_v19  ;;  %v1364_v36 = vrot.slane %v1363_v57, 1 }
 0x3ca   : > { %v1260_v47 = vadd.f32 %v1258_v8, %v1228_v2  ;;  %v1387_v49 = vrot.slane %v1386_v58, 4  ;;  %v1393_v23 = vsel %vm467_vm3, %v1342_v12, 0.0  ;;  %v1380_v45 = vrot.slane %v1379_v21, 2 }
 0x3cb   : > { %v1261_v25 = vadd.f32 %v1259_v16, %v1229_v39  ;;  %v1394_v18 = vsel %vm467_vm3, %v1343_v13, 0.0  ;;  %v1373_v39 = vrot.slane %v1372_v61, 1  ;;  %v1355_v3 = vrot.slane %v1354_v55, 1 }
 0x3cc   : > { %v1262_v27 = vmul.f32 %v1953_v15, %v1260_v47  ;;  %v1344_v28 = vmul.f32 %v1319_v59, %v1260_v47  ;;  %v1388_v20 = vadd.f32 %v1387_v49, %v1386_v58  ;;  %v1395_v29 = vadd.f32 %v1394_v18, %v1393_v23 }
 0x3cd   : > { %v1263_v30 = vmul.f32 %v1955_v17, %v1261_v25  ;;  %v1345_v50 = vmul.f32 %v1323_v51, %v1261_v25  ;;  %v1381_v44 = vadd.f32 %v1380_v45, %v1379_v21  ;;  %v1365_v41 = vadd.f32 %v1364_v36, %v1363_v57  ;;  %v1420_v17 = vld [vmem:[#allocation5] sm:$0xff] }
 0x3ce   : > { %v1264_v43 = vadd.f32 %v1262_v27, %v1230_v7  ;;  %v1396_v40 = vrot.slane %v1395_v29, 4  ;;  %v1402_v46 = vsel %vm467_vm3, %v1344_v28, 0.0  ;;  %v1389_v54 = vrot.slane %v1388_v20, 2 }
 0x3cf   : > { %v1265_v22 = vadd.f32 %v1263_v30, %v1231_v24  ;;  %v1403_v53 = vsel %vm467_vm3, %v1345_v50, 0.0  ;;  %v1382_v4 = vrot.slane %v1381_v44, 1  ;;  %v1530_v12 = vadd.f32 1.0, %v2459_v31 }
 0x3d0   : > { %1266 = vst.msk [vmem:[#allocation6] sm:$0xff] %vm467_vm3, %v1264_v43  ;;  %v1346_v6 = vmul.f32 %v1327_v38, %v1264_v43  ;;  %v1397_v32 = vadd.f32 %v1396_v40, %v1395_v29  ;;  %v1404_v9 = vadd.f32 %v1403_v53, %v1402_v46  ;;  %v1390_v52 = vadd.f32 %v1389_v54, %v1388_v20  ;;  %v1958_v43 = vld [vmem:[%s2184_s22] sm:$0xff]  ;;  %s2043_s22 = smov [#allocation8]  }
 0x3d1   : > { %1267 = vst.msk [vmem:[#allocation6 + $0x8] sm:$0xff] %vm467_vm3, %v1265_v22  ;;  %v1347_v37 = vmul.f32 %v1331_v35, %v1265_v22  ;;  %v1374_v58 = vadd.f32 %v1373_v39, %v1372_v61  ;;  %v1356_v59 = vadd.f32 %v1355_v3, %v1354_v55  ;;  %v1383_v16 = vadd.f32 %v1382_v4, %v1381_v44  ;;  %s1963_s1 = sshll.u32 %s2043_s22, 4  ;;  %s1964_s1 = int_to_ptr.vmem [resolvable:$false] %s1963_s1 }
 0x3d2   : > { %v1398_v33 = vrot.slane %v1397_v32, 2  ;;  %v1405_v60 = vrot.slane %v1404_v9, 4  ;;  %v1411_v34 = vsel %vm467_vm3, %v1346_v6, 0.0  ;;  %v1391_v14 = vrot.slane %v1390_v52, 1  ;;  %s1965_s16 = scalar_lea.vmem %s1964_s1, 256  ;;  %p1966_p1 = scmp.lt.s32.totalorder %s2517_s15, %s1964_s1 }
 0x3d3   : > { %v1412_v62 = vsel %vm467_vm3, %v1347_v37, 0.0  ;;  %v1430_v21 = vsel %vm1429_vm11, %v1365_v41, %v1356_v59  ;;  %1956 = vrcp.f32 %v1530_v12  ;;  %p1967_p2 = scmp.lt.s32.totalorder %s1965_s16, %s1959_s24 }
 0x3d4   : > { %v1406_v56 = vadd.f32 %v1405_v60, %v1404_v9  ;;  %v1413_v63 = vadd.f32 %v1412_v62, %v1411_v34  ;;  %v1399_v2 = vadd.f32 %v1398_v33, %v1397_v32  ;;  %v1392_v19 = vadd.f32 %v1391_v14, %v1390_v52 }
 0x3d5   : > { %v1432_v23 = vsel %vm1431_vm12, %v1374_v58, %v1430_v21  ;;  %p1968_p3 = por %p1967_p2, %p1966_p1 }
 0x3d6   : > { %v1407_v1 = vrot.slane %v1406_v56, 2  ;;  %v1414_v11 = vrot.slane %v1413_v63, 4  ;;  %v1400_v5 = vrot.slane %v1399_v2, 1  ;;  %v1434_v24 = vsel %vm1433_vm13, %v1383_v16, %v1432_v23 }
 0x3d7   : > { %v1436_v31 = vsel %vm1435_vm14, %v1392_v19, %v1434_v24  ;;  %p1969_p5 = pnand %p1968_p3, %p1962_p0 }
 0x3d8   : > { %v1408_v7 = vadd.f32 %v1407_v1, %v1406_v56  ;;  %v1415_v8 = vadd.f32 %v1414_v11, %v1413_v63  ;;  %v1401_v51 = vadd.f32 %v1400_v5, %v1399_v2 }
 0x3da   : > { %v1409_v13 = vrot.slane %v1408_v7, 1  ;;  %v1416_v48 = vrot.slane %v1415_v8, 2  ;;  %v1438_v26 = vsel %vm1437_vm15, %v1401_v51, %v1436_v31 }
 0x3dc   : > { %v1417_v47 = vadd.f32 %v1416_v48, %v1415_v8  ;;  %v1410_v49 = vadd.f32 %v1409_v13, %v1408_v7 }
 0x3dd   : > { %v1957_v20 = vpop.eup %1956 }
 0x3de   : > { %v1418_v15 = vrot.slane %v1417_v47, 1  ;;  %v1440_v18 = vsel %vm1439_vm1, %v1410_v49, %v1438_v26  ;;  %v1533_v29 = vmul.f32 %v1957_v20, %v2261_v10 }
 0x3e0   : > { %v1419_v25 = vadd.f32 %v1418_v15, %v1417_v47 }
 0x3e2   : > { %v1442_v27 = vsel %vm1441_vm2, %v1419_v25, %v1440_v18 }
 0x3e3   : > { %v1444_v28 = vadd.f32 %v1442_v27, %v1420_v17 }
 0x3e5   : > { %1445 = vst.msk [vmem:[#allocation5] sm:$0xff] %vm467_vm3, %v1444_v28 }
 0x3ec   : > { %v1526_v30 = vld [vmem:[#allocation5] sm:$0xff] }
 0x3ed   : > { %v1534_v50 = vmul.f32 %v1533_v29, %v1526_v30 }
 0x3ef   : > { %v1535_v42 = vpack.c.bf16 %v1534_v50, %v1534_v50 }
 0x3f1   : > { %1816 = vmatmul.mubr.msk.bf16.vlgmr.msra.gmra.mrb[12].mxu1 %vm467_vm3, %v1535_v42 }
 0x4c4   : > { %v1593_v0 = vpop.f32.mrb[12].mxu1 }
 0x4c5   : > { %v1594_v45 = vadd.f32 %v1958_v43, %v1593_v0  ;;  %v1817_v40 = vpop.f32.mrb[13].mxu1 }
 0x4c6   : > { %v1596_v10 = vpop.f32.mrb[14].mxu1 }
 0x4c7   : > { %v1818_v46 = vpop.f32.mrb[15].mxu1  ;;  %1599 = vst.msk [vmem:[%s453_s14] sm:$0xff] %vm473_vm0, %v1594_v45 }
 0x4c8   : > { %1972 = shalt.err (!%p1969_p5)
}
 0x4c9   : > { %s1973_s23 = scalar_lea.hbm %s2515_s19, 128  ;;  %s1977_s0 = scalar_lea.hbm %s2576_s13, 256 }
 0x4ca   : > { %p1974_p6 = scmp.ne.s32.totalorder %s2515_s19, %s1973_s23  ;;  %p1978_p10 = scmp.lt.u32.totalorder %s2515_s19, %s2576_s13 }
 0x4cb   : > { %p1979_p11 = scmp.lt.u32.totalorder %s1977_s0, %s1973_s23  ;;  %p1981_p13 = scmp.lt.u32.totalorder %s1973_s23, %s2515_s19 }
 0x4cc   : > { %p1975_p7 = pnand %p1974_p6, %p2154_p4 }
 0x4cd   : > { %p1980_p12 = por %p1979_p11, %p1978_p10 }
 0x4ce   : > { %p1976_p9 = pneg %p1975_p7 }
 0x4cf   : > { %p1982_p0 = por %p1981_p13, %p1980_p12 }
 0x4d1   : > { %p1983_p1 = pnand %p1982_p0, %p1976_p9 }
 0x4d3   : > { %1986 = shalt.err (!%p1983_p1)
}
 0x4d4   : > { %1835 = dma.vmem_to_hbm [thread:$0]  (%p2154_p4), %s2517_s15, 128, %s2515_s19, %s1601_s28  }
 0x4d5 PF: > { %p1841_p2 = scmp.ge.s32.totalorder %s2037_s30, 2  ;;  %s1627_s24 = sand.u32 1, %s2017_s25  }
 0x4d6   : > { %s1628_s16 = scalar_lea.sflag [#allocation9], %s1627_s24 }
 0x4d7   : > { %p1838_p3 = pnand %p1841_p2, %p2161_p8 }
 0x4d9   : > { %2012 = dma.done.wait (!%p1838_p3), %s1628_s16, 128  }
 0x4da   : > { %2014 = vsyncadd (!%p1838_p3), %s1628_s16, 4294967168  ;;  %s26_s30 = sadd.s32 1, %s2037_s30   ;;  %s2587_s18 = sld [smem:[#allocation11_spill]] }
 0x4db   : > { %p23_p5 = scmp.ge.s32.totalorder %s26_s30, 4   ;;  %s2588_s25 = smov %s2021_s26 }
 0x4dc   : > { %s2589_s26 = smov %s2025_s27  ;;  %s2590_s27 = smov %s2167_s21 }
 0x4dd   : > { %s2591_s28 = smov %s2033_s29  ;;  %25 = sbr.rel (!%p23_p5) target bundleno = 7 (0x7), region = 111 }
 0x4e0   : > { %s2592_s29 = smov %s2587_s18 }
 0x4e4   :  { %1633 = vsyncpa [#allocation9], 1 }
 0x4e5   :  { %1635 = vsyncpa [#allocation9 + $0x1], 1 }

</bundles_post_ra>
